<compile_context>
chip_gen: v7x
topology: tpu7x:2x2x1
jax: 0.10.0
libtpu: 0.0.40
codegen_flags: <defaults>
</compile_context>

<pallas_src>
import functools

import jax
import jax.numpy as jnp
from jax.experimental import pallas as pl
from jax.experimental.pallas import tpu as pltpu


# ----------------------------- Pallas kernels -----------------------------

def _gelu(x):
    # tanh-approx GELU (erf-GELU differs by <1e-3; tanh lowers cleanly on the TPU EUP)
    return jax.nn.gelu(x, approximate=True)


def _choose_tile(n):
    """Largest row tile from a fixed menu that divides n (avoids jnp.pad copies)."""
    for t in (1024, 512, 256, 128, 64, 32, 16, 8):
        if n >= t and n % t == 0:
            return t, 0
    pad = (-n) % 8
    return min(8, n + pad), pad


_PARALLEL = pltpu.CompilerParams(dimension_semantics=("parallel",))


def _pw_kernel(x_ref, w_ref, b_ref, o_ref, *, gelu):
    y = jnp.dot(x_ref[...], w_ref[...], preferred_element_type=jnp.float32) + b_ref[...]
    if gelu:
        y = _gelu(y)
    o_ref[...] = y.astype(o_ref.dtype)


def _pw_res_kernel(x_ref, w_ref, b_ref, r_ref, o_ref, *, gelu):
    y = jnp.dot(x_ref[...], w_ref[...], preferred_element_type=jnp.float32)
    y = y + b_ref[...] + r_ref[...]
    if gelu:
        y = _gelu(y)
    o_ref[...] = y.astype(o_ref.dtype)


def _mlp2_kernel(x_ref, w1_ref, b1_ref, w2_ref, b2_ref, o_ref):
    h = jnp.dot(x_ref[...], w1_ref[...], preferred_element_type=jnp.float32) + b1_ref[...]
    h = _gelu(h)
    y = jnp.dot(h, w2_ref[...], preferred_element_type=jnp.float32) + b2_ref[...]
    o_ref[...] = y.astype(o_ref.dtype)


def pointwise(x, w, b, residual=None, gelu=False):
    """y = maybe_gelu(x @ w + b [+ residual]);  x: [N, Cin] -> [N, Cout]."""
    N, cin = x.shape
    cout = w.shape[1]
    tile, pad = _choose_tile(N)
    if pad:
        x = jnp.pad(x, ((0, pad), (0, 0)))
        if residual is not None:
            residual = jnp.pad(residual, ((0, pad), (0, 0)))
    Np = N + pad
    grid = (Np // tile,)
    b2 = b.reshape(1, cout).astype(jnp.float32)

    x_spec = pl.BlockSpec((tile, cin), lambda i: (i, 0))
    w_spec = pl.BlockSpec((cin, cout), lambda i: (0, 0))
    b_spec = pl.BlockSpec((1, cout), lambda i: (0, 0))
    r_spec = pl.BlockSpec((tile, cout), lambda i: (i, 0))
    o_spec = pl.BlockSpec((tile, cout), lambda i: (i, 0))
    out_shape = jax.ShapeDtypeStruct((Np, cout), jnp.float32)

    if residual is None:
        out = pl.pallas_call(
            functools.partial(_pw_kernel, gelu=gelu),
            grid=grid, in_specs=[x_spec, w_spec, b_spec], out_specs=o_spec,
            out_shape=out_shape, compiler_params=_PARALLEL,
        )(x, w, b2)
    else:
        out = pl.pallas_call(
            functools.partial(_pw_res_kernel, gelu=gelu),
            grid=grid, in_specs=[x_spec, w_spec, b_spec, r_spec], out_specs=o_spec,
            out_shape=out_shape, compiler_params=_PARALLEL,
        )(x, w, b2, residual)
    return out[:N] if pad else out


def mlp2(x, w1, b1, w2, b2):
    """Fused 2-layer channel MLP: y = gelu(x@W1+b1)@W2+b2.  x: [N, Cin] -> [N, Cout]."""
    N, cin = x.shape
    cmid = w1.shape[1]
    cout = w2.shape[1]
    tile, pad = _choose_tile(N)
    if pad:
        x = jnp.pad(x, ((0, pad), (0, 0)))
    Np = N + pad
    out = pl.pallas_call(
        _mlp2_kernel,
        grid=(Np // tile,),
        in_specs=[pl.BlockSpec((tile, cin), lambda i: (i, 0)),
                  pl.BlockSpec((cin, cmid), lambda i: (0, 0)),
                  pl.BlockSpec((1, cmid), lambda i: (0, 0)),
                  pl.BlockSpec((cmid, cout), lambda i: (0, 0)),
                  pl.BlockSpec((1, cout), lambda i: (0, 0))],
        out_specs=pl.BlockSpec((tile, cout), lambda i: (i, 0)),
        out_shape=jax.ShapeDtypeStruct((Np, cout), jnp.float32),
        compiler_params=_PARALLEL,
    )(x, w1, b1.reshape(1, cmid).astype(jnp.float32),
      w2, b2.reshape(1, cout).astype(jnp.float32))
    return out[:N] if pad else out


def _spectral_mix_kernel(xr_ref, xi_ref, wr_ref, wi_ref, o_ref):
    xr = xr_ref[...]
    xi = xi_ref[...]
    wr = wr_ref[...]
    wi = wi_ref[...]
    # Gauss / Karatsuba complex multiply: 3 batched matmuls instead of 4.
    t1 = jnp.einsum('kbc,kcd->kbd', xr, wr, preferred_element_type=jnp.float32)
    t2 = jnp.einsum('kbc,kcd->kbd', xi, wi, preferred_element_type=jnp.float32)
    t3 = jnp.einsum('kbc,kcd->kbd', xr + xi, wr + wi,
                    preferred_element_type=jnp.float32)
    # Single lane-contiguous store: [..., real | imag].
    o_ref[...] = jnp.concatenate([t1 - t2, t3 - t1 - t2], axis=-1).astype(o_ref.dtype)


def spectral_mix(xr, xi, wr, wi, tile_k=32):
    """Per-mode complex channel mixing, blocked over the mode axis.
    xr/xi: [K, B, Cin], wr/wi: [K, Cin, Cout] -> (out_r, out_i): [K, B, Cout]."""
    K, B, cin = xr.shape
    cout = wr.shape[2]
    tile_k = min(tile_k, K)
    padk = (-K) % tile_k
    if padk:
        xr = jnp.pad(xr, ((0, padk), (0, 0), (0, 0)))
        xi = jnp.pad(xi, ((0, padk), (0, 0), (0, 0)))
        wr = jnp.pad(wr, ((0, padk), (0, 0), (0, 0)))
        wi = jnp.pad(wi, ((0, padk), (0, 0), (0, 0)))
    Kp = K + padk
    out = pl.pallas_call(
        _spectral_mix_kernel,
        grid=(Kp // tile_k,),
        in_specs=[pl.BlockSpec((tile_k, B, cin), lambda k: (k, 0, 0)),
                  pl.BlockSpec((tile_k, B, cin), lambda k: (k, 0, 0)),
                  pl.BlockSpec((tile_k, cin, cout), lambda k: (k, 0, 0)),
                  pl.BlockSpec((tile_k, cin, cout), lambda k: (k, 0, 0))],
        out_specs=pl.BlockSpec((tile_k, B, 2 * cout), lambda k: (k, 0, 0)),
        out_shape=jax.ShapeDtypeStruct((Kp, B, 2 * cout), jnp.float32),
        compiler_params=_PARALLEL,
    )(xr, xi, wr, wi)
    out = out[:K]
    return out[..., :cout], out[..., cout:]


# ------------------------------ FNO building blocks ------------------------------

def spectral_conv3d(x, wr_modes, wi_modes, n_modes, out_sizes):
    """3-D SpectralConv, channels-last, Fourier-resampled to out_sizes.
    x: [B, D, H, W, C];  wr/wi_modes: [K, Cin, Cout] with K = m0*m1*(m2//2+1)
    (modes flattened row-major over (m0, m1, m2r)).  Returns [B, Do, Ho, Wo, Cout]."""
    B, D, H, W, C = x.shape
    m0, m1, m2 = n_modes
    m2r = m2 // 2 + 1
    Do, Ho, Wo = out_sizes
    cout = wr_modes.shape[2]
    assert m0 <= min(D, Do) and m1 <= min(H, Ho) and m2r <= min(W // 2 + 1, Wo // 2 + 1)

    xf = jnp.fft.rfftn(x, axes=(1, 2, 3), norm="forward")
    xf = jnp.fft.fftshift(xf, axes=(1, 2))
    s0 = (D - m0) // 2
    s1 = (H - m1) // 2
    xm = xf[:, s0:s0 + m0, s1:s1 + m1, :m2r, :]                  # [B, m0, m1, m2r, C]

    K = m0 * m1 * m2r
    xm = jnp.transpose(xm, (1, 2, 3, 0, 4)).reshape(K, B, C)     # [K, B, C]
    o_r, o_i = spectral_mix(jnp.real(xm).astype(jnp.float32),
                            jnp.imag(xm).astype(jnp.float32),
                            wr_modes, wi_modes)
    om = jax.lax.complex(o_r, o_i).reshape(m0, m1, m2r, B, cout)
    om = jnp.transpose(om, (3, 0, 1, 2, 4))                      # [B, m0, m1, m2r, Cout]

    Wro = Wo // 2 + 1
    out_f = jnp.zeros((B, Do, Ho, Wro, cout), jnp.complex64)
    t0 = (Do - m0) // 2
    t1 = (Ho - m1) // 2
    out_f = out_f.at[:, t0:t0 + m0, t1:t1 + m1, :m2r, :].set(om)
    out_f = jnp.fft.ifftshift(out_f, axes=(1, 2))
    return jnp.fft.irfftn(out_f, s=(Do, Ho, Wo), axes=(1, 2, 3), norm="forward")


def fourier_resample_time(x, Do):
    """Fourier (spectral truncation/padding) resample along the time axis.
    x: [B, D, H, W, C] -> [B, Do, H, W, C]."""
    B, D, H, W, C = x.shape
    if D == Do:
        return x
    xf = jnp.fft.fftshift(jnp.fft.fft(x, axis=1, norm="forward"), axes=1)
    m = min(D, Do)
    s_in = (D - m) // 2
    s_out = (Do - m) // 2
    out_f = jnp.zeros((B, Do, H, W, C), jnp.complex64)
    out_f = out_f.at[:, s_out:s_out + m].set(xf[:, s_in:s_in + m])
    out_f = jnp.fft.ifftshift(out_f, axes=1)
    return jnp.real(jnp.fft.ifft(out_f, axis=1, norm="forward")).astype(jnp.float32)


def init_tfno_params(key, in_ch, hidden, lift, proj, out_ch, n_layers, n_modes):
    m0, m1, m2 = n_modes
    K = m0 * m1 * (m2 // 2 + 1)
    ks = jax.random.split(key, 4 + 3 * n_layers)

    def dense(k, a, b):
        return (1.0 / jnp.sqrt(a)) * jax.random.normal(k, (a, b), jnp.float32)

    p = {
        "lift_w1": dense(ks[0], in_ch, lift), "lift_b1": jnp.zeros((lift,), jnp.float32),
        "lift_w2": dense(ks[1], lift, hidden), "lift_b2": jnp.zeros((hidden,), jnp.float32),
        "proj_w1": dense(ks[2], hidden, proj), "proj_b1": jnp.zeros((proj,), jnp.float32),
        "proj_w2": dense(ks[3], proj, out_ch), "proj_b2": jnp.zeros((out_ch,), jnp.float32),
    }
    layers = []
    scale = 1.0 / (hidden * hidden)
    for l in range(n_layers):
        k1, k2, k3 = ks[4 + 3 * l: 7 + 3 * l]
        layers.append({
            # spectral weights already in the [K, Cin, Cout] mode-major layout the kernel wants
            "spec_wr": scale * jax.random.normal(k1, (K, hidden, hidden), jnp.float32),
            "spec_wi": scale * jax.random.normal(k2, (K, hidden, hidden), jnp.float32),
            "spec_b": jnp.zeros((hidden,), jnp.float32),
            "skip_w": dense(k3, hidden, hidden),          # linear skip, bias-free
        })
    p["layers"] = layers
    return p


def fno_forward(p, x, n_modes, output_sizes):
    """FNO, channels-last: lifting MLP -> n_layers (SpectralConv + linear skip [+gelu]) -> projection MLP.
    x: [B, D, H, W, C] -> [B, Do, Ho, Wo, out_ch]  (time axis resampled to output_sizes at layer 0)."""
    B, D, H, W, C = x.shape
    hidden = p["lift_w2"].shape[1]
    out_ch = p["proj_w2"].shape[1]
    Do, Ho, Wo = output_sizes
    assert (Ho, Wo) == (H, W)  # TODO(synk): only the time axis is Fourier-resampled here (matches module usage)

    # Lifting: fused 2-layer channel MLP (one Pallas kernel).
    h = mlp2(x.reshape(-1, C), p["lift_w1"], p["lift_b1"], p["lift_w2"], p["lift_b2"])
    h = h.reshape(B, D, H, W, hidden)

    n_layers = len(p["layers"])
    zero_b = jnp.zeros((hidden,), jnp.float32)
    for l, lp in enumerate(p["layers"]):
        Din = h.shape[1]
        not_last = l < n_layers - 1
        spec = spectral_conv3d(h, lp["spec_wr"], lp["spec_wi"], n_modes, (Do, Ho, Wo))
        if Din == Do:
            # Common case: fuse skip matmul + bias + spectral residual + gelu in one kernel.
            y = pointwise(h.reshape(-1, hidden), lp["skip_w"], lp["spec_b"],
                          residual=spec.reshape(-1, hidden), gelu=not_last)
            h = y.reshape(B, Do, Ho, Wo, hidden)
        else:
            # Resolution change: skip path must be Fourier-resampled between the matmul and the add.
            skip = pointwise(h.reshape(-1, hidden), lp["skip_w"], zero_b, gelu=False)
            skip = fourier_resample_time(skip.reshape(B, Din, H, W, hidden), Do)
            y = spec + skip + lp["spec_b"]
            h = _gelu(y) if not_last else y

    # Projection: fused 2-layer channel MLP (one Pallas kernel).
    y = mlp2(h.reshape(-1, hidden), p["proj_w1"], p["proj_b1"], p["proj_w2"], p["proj_b2"])
    return y.reshape(B, Do, Ho, Wo, out_ch)


def tfno3d_forward(p, x, n_modes, teacher_forcing_steps=15):
    """Mirror of TFNO3DModule.forward.  x: [B, T, C, H, W] -> [B, T, C, H, W]."""
    B, T, C, H, W = x.shape
    Do = T - teacher_forcing_steps
    x_in = jnp.transpose(x[:, :10], (0, 1, 3, 4, 2))       # [B, D<=10, H, W, C] channels-last
    outs = fno_forward(p, x_in, n_modes, (Do, H, W))       # [B, Do, H, W, out_ch]
    outs = jnp.transpose(outs, (0, 1, 4, 2, 3))            # [B, Do, out_ch, H, W]
    return jnp.concatenate([x[:, :teacher_forcing_steps], outs], axis=1)


# ------------------------------------ main ------------------------------------

if __name__ == "__main__":
    B, T, C, H, W = 2, 16, 3, 16, 16
    n_modes = (4, 8, 8)
    hidden, lift, proj = 32, 32, 32
    n_layers = 2
    tf_steps = 12                      # output_shape time = T - tf = 4 (exercises the resample path)

    key = jax.random.PRNGKey(0)
    kx, kp = jax.random.split(key)
    x = jax.random.normal(kx, (B, T, C, H, W), jnp.float32)
    params = init_tfno_params(kp, in_ch=C, hidden=hidden, lift=lift, proj=proj,
                              out_ch=C, n_layers=n_layers, n_modes=n_modes)

    # Quick numeric sanity check of the fused-MLP Pallas kernel against a plain-JAX reference.
    xt = jax.random.normal(jax.random.PRNGKey(1), (512, C), jnp.float32)
    ref = jnp.einsum('nc,cd->nd', jax.nn.gelu(
        jnp.einsum('nc,cl->nl', xt, params["lift_w1"],
                   precision=jax.lax.Precision.HIGHEST) + params["lift_b1"],
        approximate=True), params["lift_w2"],
        precision=jax.lax.Precision.HIGHEST) + params["lift_b2"]
    got = mlp2(xt, params["lift_w1"], params["lift_b1"], params["lift_w2"], params["lift_b2"])
    assert jnp.max(jnp.abs(got - ref)) < 1e-2

    fwd = jax.jit(lambda p, xx: tfno3d_forward(p, xx, n_modes, tf_steps))
    y = fwd(params, x)
    jax.block_until_ready(y)
    assert y.shape == (B, T, C, H, W) and y.dtype == jnp.float32
    assert bool(jnp.all(jnp.isfinite(y)))
    print("KERNEL_OK")
</pallas_src>

<mosaic_0001>
module attributes {stable_mosaic.version = 11 : i64} {
  func.func @_mlp2_kernel(%arg0: i32, %arg1: memref<512x3xf32, #tpu.memory_space<vmem>>, %arg2: memref<3x32xf32, #tpu.memory_space<vmem>>, %arg3: memref<1x32xf32, #tpu.memory_space<vmem>>, %arg4: memref<32x32xf32, #tpu.memory_space<vmem>>, %arg5: memref<1x32xf32, #tpu.memory_space<vmem>>, %arg6: memref<512x32xf32, #tpu.memory_space<vmem>>) attributes {dimension_semantics = [#tpu.dimension_semantics<parallel>], iteration_bounds = array<i64: 1>, scalar_prefetch = 0 : i64, scratch_operands = 0 : i64, tpu.core_type = #tpu.core_type<tc>, window_params = [{transform_indices = @transform_0, window_bounds = array<i64: 512, 3>}, {pipeline_mode = #tpu.pipeline_mode<synchronous>, transform_indices = @transform_1, window_bounds = array<i64: 3, 32>}, {pipeline_mode = #tpu.pipeline_mode<synchronous>, transform_indices = @transform_2, window_bounds = array<i64: 1, 32>}, {pipeline_mode = #tpu.pipeline_mode<synchronous>, transform_indices = @transform_3, window_bounds = array<i64: 32, 32>}, {pipeline_mode = #tpu.pipeline_mode<synchronous>, transform_indices = @transform_4, window_bounds = array<i64: 1, 32>}, {transform_indices = @transform_5, window_bounds = array<i64: 512, 32>}]} {
    %c0 = arith.constant 0 : index
    %c0_0 = arith.constant 0 : index
    %0 = vector.load %arg1[%c0, %c0_0] : memref<512x3xf32, #tpu.memory_space<vmem>>, vector<512x3xf32>
    %c0_1 = arith.constant 0 : index
    %c0_2 = arith.constant 0 : index
    %1 = vector.load %arg2[%c0_1, %c0_2] : memref<3x32xf32, #tpu.memory_space<vmem>>, vector<3x32xf32>
    %cst = arith.constant dense<0.000000e+00> : vector<512x32xf32>
    %2 = tpu.matmul %0, %1, %cst {dimension_numbers = #tpu.dot_dimension_numbers<[1], [0], [0], [1], [0, 0, 1, 1], [], []>} : vector<512x3xf32>, vector<3x32xf32>, vector<512x32xf32> -> vector<512x32xf32>
    %c0_3 = arith.constant 0 : index
    %c0_4 = arith.constant 0 : index
    %3 = vector.load %arg3[%c0_3, %c0_4] : memref<1x32xf32, #tpu.memory_space<vmem>>, vector<1x32xf32>
    %4 = vector.broadcast %3 : vector<1x32xf32> to vector<512x32xf32>
    %5 = arith.addf %2, %4 : vector<512x32xf32>
    %6 = arith.mulf %5, %5 : vector<512x32xf32>
    %7 = arith.mulf %5, %6 : vector<512x32xf32>
    %cst_5 = arith.constant 4.471500e-02 : f32
    %8 = vector.broadcast %cst_5 : f32 to vector<512x32xf32>
    %9 = arith.mulf %8, %7 : vector<512x32xf32>
    %10 = arith.addf %5, %9 : vector<512x32xf32>
    %cst_6 = arith.constant 0.797884583 : f32
    %11 = vector.broadcast %cst_6 : f32 to vector<512x32xf32>
    %12 = arith.mulf %11, %10 : vector<512x32xf32>
    %13 = math.tanh %12 : vector<512x32xf32>
    %cst_7 = arith.constant 1.000000e+00 : f32
    %14 = vector.broadcast %cst_7 : f32 to vector<512x32xf32>
    %15 = arith.addf %14, %13 : vector<512x32xf32>
    %cst_8 = arith.constant 5.000000e-01 : f32
    %16 = vector.broadcast %cst_8 : f32 to vector<512x32xf32>
    %17 = arith.mulf %16, %15 : vector<512x32xf32>
    %18 = arith.mulf %5, %17 : vector<512x32xf32>
    %c0_9 = arith.constant 0 : index
    %c0_10 = arith.constant 0 : index
    %19 = vector.load %arg4[%c0_9, %c0_10] : memref<32x32xf32, #tpu.memory_space<vmem>>, vector<32x32xf32>
    %cst_11 = arith.constant dense<0.000000e+00> : vector<512x32xf32>
    %20 = tpu.matmul %18, %19, %cst_11 {dimension_numbers = #tpu.dot_dimension_numbers<[1], [0], [0], [1], [0, 0, 1, 1], [], []>} : vector<512x32xf32>, vector<32x32xf32>, vector<512x32xf32> -> vector<512x32xf32>
    %c0_12 = arith.constant 0 : index
    %c0_13 = arith.constant 0 : index
    %21 = vector.load %arg5[%c0_12, %c0_13] : memref<1x32xf32, #tpu.memory_space<vmem>>, vector<1x32xf32>
    %22 = vector.broadcast %21 : vector<1x32xf32> to vector<512x32xf32>
    %23 = arith.addf %20, %22 : vector<512x32xf32>
    %c0_14 = arith.constant 0 : index
    %c0_15 = arith.constant 0 : index
    %24 = vector.load %arg6[%c0_14, %c0_15] : memref<512x32xf32, #tpu.memory_space<vmem>>, vector<512x32xf32>
    tpu.vector_store %arg6[%c0_14, %c0_15], %23 {strides = array<i32>} : memref<512x32xf32, #tpu.memory_space<vmem>>, vector<512x32xf32>,
    return
  }
  func.func @transform_0(%arg0: i32) -> (i32, i32) {
    %c0_i32 = arith.constant 0 : i32
    %c0_i32_0 = arith.constant 0 : i32
    return %arg0, %c0_i32 : i32, i32
  }
  func.func @transform_1(%arg0: i32) -> (i32, i32) {
    %c0_i32 = arith.constant 0 : i32
    %c0_i32_0 = arith.constant 0 : i32
    %c0_i32_1 = arith.constant 0 : i32
    return %c0_i32, %c0_i32_0 : i32, i32
  }
  func.func @transform_2(%arg0: i32) -> (i32, i32) {
    %c0_i32 = arith.constant 0 : i32
    %c0_i32_0 = arith.constant 0 : i32
    %c0_i32_1 = arith.constant 0 : i32
    return %c0_i32, %c0_i32_0 : i32, i32
  }
  func.func @transform_3(%arg0: i32) -> (i32, i32) {
    %c0_i32 = arith.constant 0 : i32
    %c0_i32_0 = arith.constant 0 : i32
    %c0_i32_1 = arith.constant 0 : i32
    return %c0_i32, %c0_i32_0 : i32, i32
  }
  func.func @transform_4(%arg0: i32) -> (i32, i32) {
    %c0_i32 = arith.constant 0 : i32
    %c0_i32_0 = arith.constant 0 : i32
    %c0_i32_1 = arith.constant 0 : i32
    return %c0_i32, %c0_i32_0 : i32, i32
  }
  func.func @transform_5(%arg0: i32) -> (i32, i32) {
    %c0_i32 = arith.constant 0 : i32
    %c0_i32_0 = arith.constant 0 : i32
    return %arg0, %c0_i32 : i32, i32
  }
}

</mosaic_0001>

<bundles_post_ra>
// kernel: tpu_custom_call.1
= control target key start
LH: loop header
LB: loop body
LE: loop exit
PB: predicated region body
PF: predicated region fallthrough
CT: control target
= control target key end

     0   :  { %vm285_vm0 = vcmask 1042432   ;;  %vm92_vm1 = vcmask 23552   ;;  %vm1261_vm2 = vcmask 261120   ;;  %s3920_s1 = inlined_call_operand.vmem [shape: f32[3,32], index: 1, kind: input, shape index: {}]   ;;  %s3921_s0 = inlined_call_operand.vmem [shape: f32[512,3], index: 0, kind: input, shape index: {}]   ;;  %s3922_s3 = inlined_call_operand.vmem [shape: f32[32,32], index: 3, kind: input, shape index: {}]   ;;  %s3923_s2 = inlined_call_operand.vmem [shape: f32[1,32], index: 2, kind: input, shape index: {}]   ;;  %s3924_s4 = inlined_call_operand.vmem [shape: f32[1,32], index: 4, kind: input, shape index: {}]   ;;  %s3925_s5 = inlined_call_operand.vmem [shape: f32[512,32], index: 5, kind: output, shape index: {}]  }
   0x1   :  { %v84_v0 = vld [vmem:[%s3920_s1] sm:$0x7]  ;;  %v21_v2 = vld [vmem:[%s3921_s0 + $0x8] sm:$0xff]  ;;  %v22_v3 = vld [vmem:[%s3921_s0 + $0x10] sm:$0xff] }
   0x2   :  { %v20_v1 = vld [vmem:[%s3921_s0] sm:$0xff]  ;;  %2171 = vmatprep.subr.msk.mxu0 %vm285_vm0, %v84_v0  ;;  %v23_v4 = vld [vmem:[%s3921_s0 + $0x18] sm:$0xff]  ;;  %v25_v6 = vld [vmem:[%s3921_s0 + $0x28] sm:$0xff] }
   0x3   :  { %2173 = vmatprep.mubr.msk.f32.mxu0 %vm92_vm1, %v20_v1  ;;  %2172 = vmatpush3.msk.msra.mxu0 %vm285_vm0, %v84_v0  ;;  %v24_v5 = vld [vmem:[%s3921_s0 + $0x20] sm:$0xff]  ;;  %v26_v7 = vld [vmem:[%s3921_s0 + $0x30] sm:$0xff]  ;;  %v27_v8 = vld [vmem:[%s3921_s0 + $0x38] sm:$0xff] }
   0x4   :  { %2174 = vmatmul.mubr.msk.f32.vlgmr.msra.gmra.mrb[0].mxu0 %vm92_vm1, %v21_v2  ;;  %v28_v9 = vld [vmem:[%s3921_s0 + $0x40] sm:$0xff]  ;;  %v29_v10 = vld [vmem:[%s3921_s0 + $0x48] sm:$0xff]  ;;  %v30_v11 = vld [vmem:[%s3921_s0 + $0x50] sm:$0xff] }
   0x5   :  { %2176 = vmatprep.mubr.msk.f32.mxu0 %vm92_vm1, %v22_v3  ;;  %v31_v12 = vld [vmem:[%s3921_s0 + $0x58] sm:$0xff]  ;;  %v32_v13 = vld [vmem:[%s3921_s0 + $0x60] sm:$0xff]  ;;  %v33_v14 = vld [vmem:[%s3921_s0 + $0x68] sm:$0xff] }
   0x6   :  { %v34_v15 = vld [vmem:[%s3921_s0 + $0x70] sm:$0xff]  ;;  %v35_v16 = vld [vmem:[%s3921_s0 + $0x78] sm:$0xff]  ;;  %v36_v17 = vld [vmem:[%s3921_s0 + $0x80] sm:$0xff] }
   0x7   :  { %v37_v18 = vld [vmem:[%s3921_s0 + $0x88] sm:$0xff]  ;;  %v38_v19 = vld [vmem:[%s3921_s0 + $0x90] sm:$0xff]  ;;  %v39_v20 = vld [vmem:[%s3921_s0 + $0x98] sm:$0xff] }
   0x8   :  { %2177 = vmatmul.mubr.msk.f32.gmra.mrb[2].mxu0 %vm92_vm1, %v23_v4  ;;  %v40_v21 = vld [vmem:[%s3921_s0 + $0xa0] sm:$0xff]  ;;  %v41_v22 = vld [vmem:[%s3921_s0 + $0xa8] sm:$0xff]  ;;  %v42_v23 = vld [vmem:[%s3921_s0 + $0xb0] sm:$0xff] }
   0x9   :  { %2179 = vmatprep.mubr.msk.f32.mxu0 %vm92_vm1, %v24_v5  ;;  %v43_v24 = vld [vmem:[%s3921_s0 + $0xb8] sm:$0xff]  ;;  %v44_v25 = vld [vmem:[%s3921_s0 + $0xc0] sm:$0xff]  ;;  %v45_v26 = vld [vmem:[%s3921_s0 + $0xc8] sm:$0xff] }
   0xa   :  { %v46_v27 = vld [vmem:[%s3921_s0 + $0xd0] sm:$0xff]  ;;  %v47_v28 = vld [vmem:[%s3921_s0 + $0xd8] sm:$0xff]  ;;  %v48_v29 = vld [vmem:[%s3921_s0 + $0xe0] sm:$0xff] }
   0xb   :  { %v49_v30 = vld [vmem:[%s3921_s0 + $0xe8] sm:$0xff]  ;;  %v50_v31 = vld [vmem:[%s3921_s0 + $0xf0] sm:$0xff]  ;;  %v51_v32 = vld [vmem:[%s3921_s0 + $0xf8] sm:$0xff] }
   0xc   :  { %2180 = vmatmul.mubr.msk.f32.gmra.mrb[4].mxu0 %vm92_vm1, %v25_v6  ;;  %v52_v33 = vld [vmem:[%s3921_s0 + $0x100] sm:$0xff]  ;;  %v53_v34 = vld [vmem:[%s3921_s0 + $0x108] sm:$0xff]  ;;  %v54_v35 = vld [vmem:[%s3921_s0 + $0x110] sm:$0xff] }
   0xd   :  { %2182 = vmatprep.mubr.msk.f32.mxu0 %vm92_vm1, %v26_v7  ;;  %v55_v36 = vld [vmem:[%s3921_s0 + $0x118] sm:$0xff]  ;;  %v56_v37 = vld [vmem:[%s3921_s0 + $0x120] sm:$0xff]  ;;  %v57_v38 = vld [vmem:[%s3921_s0 + $0x128] sm:$0xff] }
   0xe   :  { %v58_v39 = vld [vmem:[%s3921_s0 + $0x130] sm:$0xff]  ;;  %v59_v40 = vld [vmem:[%s3921_s0 + $0x138] sm:$0xff]  ;;  %v60_v41 = vld [vmem:[%s3921_s0 + $0x140] sm:$0xff] }
   0xf   :  { %v61_v42 = vld [vmem:[%s3921_s0 + $0x148] sm:$0xff]  ;;  %v62_v43 = vld [vmem:[%s3921_s0 + $0x150] sm:$0xff]  ;;  %v63_v44 = vld [vmem:[%s3921_s0 + $0x158] sm:$0xff] }
  0x10   :  { %2183 = vmatmul.mubr.msk.f32.gmra.mrb[6].mxu0 %vm92_vm1, %v27_v8  ;;  %v64_v45 = vld [vmem:[%s3921_s0 + $0x160] sm:$0xff]  ;;  %v65_v46 = vld [vmem:[%s3921_s0 + $0x168] sm:$0xff]  ;;  %v66_v47 = vld [vmem:[%s3921_s0 + $0x170] sm:$0xff] }
  0x11   :  { %2185 = vmatprep.mubr.msk.f32.mxu0 %vm92_vm1, %v28_v9  ;;  %v67_v48 = vld [vmem:[%s3921_s0 + $0x178] sm:$0xff]  ;;  %v68_v49 = vld [vmem:[%s3921_s0 + $0x180] sm:$0xff]  ;;  %v69_v50 = vld [vmem:[%s3921_s0 + $0x188] sm:$0xff] }
  0x12   :  { %v70_v51 = vld [vmem:[%s3921_s0 + $0x190] sm:$0xff]  ;;  %v71_v52 = vld [vmem:[%s3921_s0 + $0x198] sm:$0xff]  ;;  %v72_v53 = vld [vmem:[%s3921_s0 + $0x1a0] sm:$0xff] }
  0x13   :  { %v73_v54 = vld [vmem:[%s3921_s0 + $0x1a8] sm:$0xff]  ;;  %v74_v55 = vld [vmem:[%s3921_s0 + $0x1b0] sm:$0xff]  ;;  %v1250_v56 = vld [vmem:[%s3922_s3] sm:$0xff] }
  0x14   :  { %2186 = vmatmul.mubr.msk.f32.gmra.mrb[8].mxu0 %vm92_vm1, %v29_v10  ;;  %v1251_v57 = vld [vmem:[%s3922_s3 + $0x8] sm:$0xff]  ;;  %v75_v58 = vld [vmem:[%s3921_s0 + $0x1b8] sm:$0xff]  ;;  %v76_v60 = vld [vmem:[%s3921_s0 + $0x1c0] sm:$0xff] }
  0x15   :  { %2188 = vmatprep.mubr.msk.f32.mxu0 %vm92_vm1, %v30_v11  ;;  %v2373_v59 = vpack.c.bf16 %v1251_v57, %v1250_v56  ;;  %v1252_v61 = vld [vmem:[%s3922_s3 + $0x10] sm:$0xff]  ;;  %v1253_v62 = vld [vmem:[%s3922_s3 + $0x18] sm:$0xff]  ;;  %v77_v63 = vld [vmem:[%s3921_s0 + $0x1c8] sm:$0xff] }
  0x16   :  { %v2377_v0 = vpack.c.bf16 %v1253_v62, %v1252_v61  ;;  %v78_v1 = vld [vmem:[%s3921_s0 + $0x1d0] sm:$0xff]  ;;  %v79_v2 = vld [vmem:[%s3921_s0 + $0x1d8] sm:$0xff]  ;;  %v80_v3 = vld [vmem:[%s3921_s0 + $0x1e0] sm:$0xff] }
  0x17   :  { %2374 = vmatprep.subr.bf16.mxu1 %v2373_v59  ;;  %v81_v4 = vld [vmem:[%s3921_s0 + $0x1e8] sm:$0xff]  ;;  %v82_v5 = vld [vmem:[%s3921_s0 + $0x1f0] sm:$0xff]  ;;  %v83_v6 = vld [vmem:[%s3921_s0 + $0x1f8] sm:$0xff] }
  0x18   :  { %2189 = vmatmul.mubr.msk.f32.gmra.mrb[10].mxu0 %vm92_vm1, %v31_v12  ;;  %2376 = vmatpush3.bf16.msra.mxu1 %v2373_v59  ;;  %v2814_v7 = vld [vmem:[%s3923_s2] ss:$0 sm:$0xff] }
  0x19   :  { %2191 = vmatprep.mubr.msk.f32.mxu0 %vm92_vm1, %v32_v13  ;;  %2378 = vmatprep.subr.bf16.mxu1 %v2377_v0 }
  0x1c   :  { %2192 = vmatmul.mubr.msk.f32.gmra.mrb[12].mxu0 %vm92_vm1, %v33_v14  ;;  %2380 = vmatpush3.bf16.msra.mxu1 %v2377_v0 }
  0x1d   :  { %2194 = vmatprep.mubr.msk.f32.mxu0 %vm92_vm1, %v34_v15 }
  0x20   :  { %2195 = vmatmul.mubr.msk.f32.gmra.mrb[14].mxu0 %vm92_vm1, %v35_v16 }
  0x21   :  { %2197 = vmatprep.mubr.msk.f32.mxu0 %vm92_vm1, %v36_v17 }
  0x24   :  { %2198 = vmatmul.mubr.msk.f32.gmra.mrb[16].mxu0 %vm92_vm1, %v37_v18 }
  0x25   :  { %2200 = vmatprep.mubr.msk.f32.mxu0 %vm92_vm1, %v38_v19 }
  0x28   :  { %2201 = vmatmul.mubr.msk.f32.gmra.mrb[18].mxu0 %vm92_vm1, %v39_v20 }
  0x29   :  { %2203 = vmatprep.mubr.msk.f32.mxu0 %vm92_vm1, %v40_v21 }
  0x2c   :  { %2204 = vmatmul.mubr.msk.f32.gmra.mrb[20].mxu0 %vm92_vm1, %v41_v22 }
  0x2d   :  { %2206 = vmatprep.mubr.msk.f32.mxu0 %vm92_vm1, %v42_v23 }
  0x30   :  { %2207 = vmatmul.mubr.msk.f32.gmra.mrb[22].mxu0 %vm92_vm1, %v43_v24 }
  0x31   :  { %2209 = vmatprep.mubr.msk.f32.mxu0 %vm92_vm1, %v44_v25 }
  0x34   :  { %2210 = vmatmul.mubr.msk.f32.gmra.mrb[24].mxu0 %vm92_vm1, %v45_v26 }
  0x35   :  { %2212 = vmatprep.mubr.msk.f32.mxu0 %vm92_vm1, %v46_v27 }
  0x38   :  { %2213 = vmatmul.mubr.msk.f32.gmra.mrb[26].mxu0 %vm92_vm1, %v47_v28 }
  0x39   :  { %2215 = vmatprep.mubr.msk.f32.mxu0 %vm92_vm1, %v48_v29 }
  0x3c   :  { %2216 = vmatmul.mubr.msk.f32.gmra.mrb[28].mxu0 %vm92_vm1, %v49_v30 }
  0x3d   :  { %2218 = vmatprep.mubr.msk.f32.mxu0 %vm92_vm1, %v50_v31 }
  0x40   :  { %2219 = vmatmul.mubr.msk.f32.gmra.mrb[30].mxu0 %vm92_vm1, %v51_v32 }
  0x41   :  { %2221 = vmatprep.mubr.msk.f32.mxu0 %vm92_vm1, %v52_v33 }
  0x44   :  { %2222 = vmatmul.mubr.msk.f32.gmra.mrb[32].mxu0 %vm92_vm1, %v53_v34 }
  0x45   :  { %2224 = vmatprep.mubr.msk.f32.mxu0 %vm92_vm1, %v54_v35 }
  0x48   :  { %2225 = vmatmul.mubr.msk.f32.gmra.mrb[34].mxu0 %vm92_vm1, %v55_v36 }
  0x49   :  { %2227 = vmatprep.mubr.msk.f32.mxu0 %vm92_vm1, %v56_v37 }
  0x4c   :  { %2228 = vmatmul.mubr.msk.f32.gmra.mrb[36].mxu0 %vm92_vm1, %v57_v38 }
  0x4d   :  { %2230 = vmatprep.mubr.msk.f32.mxu0 %vm92_vm1, %v58_v39 }
  0x50   :  { %2231 = vmatmul.mubr.msk.f32.gmra.mrb[38].mxu0 %vm92_vm1, %v59_v40 }
  0x51   :  { %2233 = vmatprep.mubr.msk.f32.mxu0 %vm92_vm1, %v60_v41 }
  0x54   :  { %2234 = vmatmul.mubr.msk.f32.gmra.mrb[40].mxu0 %vm92_vm1, %v61_v42 }
  0x55   :  { %2236 = vmatprep.mubr.msk.f32.mxu0 %vm92_vm1, %v62_v43 }
  0x58   :  { %2237 = vmatmul.mubr.msk.f32.gmra.mrb[42].mxu0 %vm92_vm1, %v63_v44 }
  0x59   :  { %2239 = vmatprep.mubr.msk.f32.mxu0 %vm92_vm1, %v64_v45 }
  0x5c   :  { %2240 = vmatmul.mubr.msk.f32.gmra.mrb[44].mxu0 %vm92_vm1, %v65_v46 }
  0x5d   :  { %2242 = vmatprep.mubr.msk.f32.mxu0 %vm92_vm1, %v66_v47 }
  0x60   :  { %2243 = vmatmul.mubr.msk.f32.gmra.mrb[46].mxu0 %vm92_vm1, %v67_v48 }
  0x61   :  { %2245 = vmatprep.mubr.msk.f32.mxu0 %vm92_vm1, %v68_v49 }
  0x64   :  { %2246 = vmatmul.mubr.msk.f32.gmra.mrb[48].mxu0 %vm92_vm1, %v69_v50 }
  0x65   :  { %2248 = vmatprep.mubr.msk.f32.mxu0 %vm92_vm1, %v70_v51 }
  0x68   :  { %2249 = vmatmul.mubr.msk.f32.gmra.mrb[50].mxu0 %vm92_vm1, %v71_v52 }
  0x69   :  { %2251 = vmatprep.mubr.msk.f32.mxu0 %vm92_vm1, %v72_v53 }
  0x6c   :  { %2252 = vmatmul.mubr.msk.f32.gmra.mrb[52].mxu0 %vm92_vm1, %v73_v54 }
  0x6d   :  { %2254 = vmatprep.mubr.msk.f32.mxu0 %vm92_vm1, %v74_v55 }
  0x70   :  { %2255 = vmatmul.mubr.msk.f32.gmra.mrb[54].mxu0 %vm92_vm1, %v75_v58 }
  0x71   :  { %2257 = vmatprep.mubr.msk.f32.mxu0 %vm92_vm1, %v76_v60 }
  0x74   :  { %2258 = vmatmul.mubr.msk.f32.gmra.mrb[56].mxu0 %vm92_vm1, %v77_v63 }
  0x75   :  { %2260 = vmatprep.mubr.msk.f32.mxu0 %vm92_vm1, %v78_v1 }
  0x78   :  { %2261 = vmatmul.mubr.msk.f32.gmra.mrb[58].mxu0 %vm92_vm1, %v79_v2 }
  0x79   :  { %2263 = vmatprep.mubr.msk.f32.mxu0 %vm92_vm1, %v80_v3 }
  0x7c   :  { %2264 = vmatmul.mubr.msk.f32.gmra.mrb[60].mxu0 %vm92_vm1, %v81_v4 }
  0x7d   :  { %2266 = vmatprep.mubr.msk.f32.mxu0 %vm92_vm1, %v82_v5 }
  0x80   :  { %2267 = vmatmul.mubr.msk.f32.gmra.mrb[62].mxu0 %vm92_vm1, %v83_v6 }
  0xd7   :  { %v2175_v8 = vpop.f32.mrb[0].mxu0 }
  0xd8   :  { %v2817_v9 = vadd.f32 %v2175_v8, %v2814_v7  ;;  %v355_v10 = vpop.f32.mrb[1].mxu0 }
  0xd9   :  { %v2820_v11 = vadd.f32 %v2814_v7, %v355_v10 }
  0xda   :  { %v675_v12 = vmul.f32 %v2817_v9, %v2817_v9 }
  0xdb   :  { %v674_v13 = vmul.f32 %v2820_v11, %v2820_v11  ;;  %v2178_v14 = vpop.f32.mrb[2].mxu0 }
  0xdc   :  { %v739_v15 = vmul.f32 %v675_v12, %v2817_v9  ;;  %v2828_v16 = vadd.f32 %v2178_v14, %v2814_v7  ;;  %v365_v17 = vpop.f32.mrb[3].mxu0 }
  0xdd   :  { %v738_v18 = vmul.f32 %v674_v13, %v2820_v11  ;;  %v2832_v19 = vadd.f32 %v2814_v7, %v365_v17 }
  0xde   :  { %v803_v20 = vmul.f32 0.044715, %v739_v15  ;;  %v677_v21 = vmul.f32 %v2828_v16, %v2828_v16 }
  0xdf   :  { %v802_v22 = vmul.f32 0.044715, %v738_v18  ;;  %v676_v23 = vmul.f32 %v2832_v19, %v2832_v19  ;;  %v2181_v24 = vpop.f32.mrb[4].mxu0 }
  0xe0   :  { %v867_v25 = vadd.f32 %v803_v20, %v2817_v9  ;;  %v741_v26 = vmul.f32 %v677_v21, %v2828_v16  ;;  %v2841_v27 = vadd.f32 %v2181_v24, %v2814_v7  ;;  %v375_v28 = vpop.f32.mrb[5].mxu0 }
  0xe1   :  { %v740_v29 = vmul.f32 %v676_v23, %v2832_v19  ;;  %v2845_v30 = vadd.f32 %v2814_v7, %v375_v28  ;;  %v866_v31 = vadd.f32 %v802_v22, %v2820_v11 }
  0xe2   :  { %v931_v32 = vmul.f32 0.7978846, %v867_v25  ;;  %v805_v33 = vmul.f32 0.044715, %v741_v26  ;;  %v679_v34 = vmul.f32 %v2841_v27, %v2841_v27 }
  0xe3   :  { %v804_v35 = vmul.f32 0.044715, %v740_v29  ;;  %v678_v36 = vmul.f32 %v2845_v30, %v2845_v30  ;;  %v2184_v37 = vpop.f32.mrb[6].mxu0  ;;  %v930_v38 = vmul.f32 0.7978846, %v866_v31 }
  0xe4   :  { %2381 = vtanh.f32 %v931_v32  ;;  %v869_v39 = vadd.f32 %v805_v33, %v2828_v16  ;;  %v743_v40 = vmul.f32 %v679_v34, %v2841_v27  ;;  %v2855_v41 = vadd.f32 %v2184_v37, %v2814_v7  ;;  %v385_v42 = vpop.f32.mrb[7].mxu0 }
  0xe5   :  { %v868_v43 = vadd.f32 %v804_v35, %v2832_v19  ;;  %v742_v44 = vmul.f32 %v678_v36, %v2845_v30  ;;  %v2860_v45 = vadd.f32 %v2814_v7, %v385_v42  ;;  %2383 = vtanh.f32 %v930_v38 }
  0xe6   :  { %v807_v46 = vmul.f32 0.044715, %v743_v40  ;;  %v681_v47 = vmul.f32 %v2855_v41, %v2855_v41  ;;  %v933_v51 = vmul.f32 0.7978846, %v869_v39 }
  0xe7   :  { %v806_v48 = vmul.f32 0.044715, %v742_v44  ;;  %v680_v49 = vmul.f32 %v2860_v45, %v2860_v45  ;;  %v2187_v50 = vpop.f32.mrb[8].mxu0  ;;  %v932_v56 = vmul.f32 0.7978846, %v868_v43 }
  0xe8   :  { %v871_v52 = vadd.f32 %v807_v46, %v2841_v27  ;;  %v745_v53 = vmul.f32 %v681_v47, %v2855_v41  ;;  %v2869_v54 = vadd.f32 %v2187_v50, %v2814_v7  ;;  %v395_v55 = vpop.f32.mrb[9].mxu0  ;;  %2385 = vtanh.f32 %v933_v51 }
  0xe9   :  { %v870_v57 = vadd.f32 %v806_v48, %v2845_v30  ;;  %v744_v58 = vmul.f32 %v680_v49, %v2860_v45  ;;  %v2874_v59 = vadd.f32 %v2814_v7, %v395_v55  ;;  %2387 = vtanh.f32 %v932_v56 }
  0xea   :  { %v935_v60 = vmul.f32 0.7978846, %v871_v52  ;;  %v809_v61 = vmul.f32 0.044715, %v745_v53  ;;  %v683_v62 = vmul.f32 %v2869_v54, %v2869_v54 }
  0xeb   :  { %v934_v63 = vmul.f32 0.7978846, %v870_v57  ;;  %v808_v0 = vmul.f32 0.044715, %v744_v58  ;;  %v682_v1 = vmul.f32 %v2874_v59, %v2874_v59  ;;  %v2190_v2 = vpop.f32.mrb[10].mxu0 }
  0xec   :  { %v873_v3 = vadd.f32 %v809_v61, %v2855_v41  ;;  %v747_v4 = vmul.f32 %v683_v62, %v2869_v54  ;;  %v2883_v5 = vadd.f32 %v2190_v2, %v2814_v7  ;;  %v405_v6 = vpop.f32.mrb[11].mxu0  ;;  %2389 = vtanh.f32 %v935_v60 }
  0xed   :  { %v872_v8 = vadd.f32 %v808_v0, %v2860_v45  ;;  %v746_v10 = vmul.f32 %v682_v1, %v2874_v59  ;;  %v2888_v12 = vadd.f32 %v2814_v7, %v405_v6  ;;  %2391 = vtanh.f32 %v934_v63 }
  0xee   :  { %v2382_v13 = vpop.eup %2381  ;;  %v937_v14 = vmul.f32 0.7978846, %v873_v3  ;;  %v811_v15 = vmul.f32 0.044715, %v747_v4  ;;  %v685_v17 = vmul.f32 %v2883_v5, %v2883_v5 }
  0xef   :  { %v2384_v18 = vpop.eup %2383  ;;  %v936_v20 = vmul.f32 0.7978846, %v872_v8  ;;  %v810_v21 = vmul.f32 0.044715, %v746_v10  ;;  %v684_v22 = vmul.f32 %v2888_v12, %v2888_v12  ;;  %v2193_v23 = vpop.f32.mrb[12].mxu0  ;;  %v1059_v29 = vadd.f32 1.0, %v2382_v13 }
  0xf0   :  { %v875_v24 = vadd.f32 %v811_v15, %v2869_v54  ;;  %v749_v25 = vmul.f32 %v685_v17, %v2883_v5  ;;  %v2897_v26 = vadd.f32 %v2193_v23, %v2814_v7  ;;  %v415_v28 = vpop.f32.mrb[13].mxu0  ;;  %2393 = vtanh.f32 %v937_v14 }
  0xf1   :  { %v874_v31 = vadd.f32 %v810_v21, %v2874_v59  ;;  %v748_v32 = vmul.f32 %v684_v22, %v2888_v12  ;;  %v2902_v33 = vadd.f32 %v2814_v7, %v415_v28  ;;  %v1058_v37 = vadd.f32 1.0, %v2384_v18 }
  0xf2   :  { %v939_v34 = vmul.f32 0.7978846, %v875_v24  ;;  %v813_v35 = vmul.f32 0.044715, %v749_v25  ;;  %v687_v36 = vmul.f32 %v2897_v26, %v2897_v26  ;;  %2395 = vtanh.f32 %v936_v20  ;;  %v2386_v52 = vpop.eup %2385 }
  0xf3   :  { %v938_v38 = vmul.f32 0.7978846, %v874_v31  ;;  %v812_v39 = vmul.f32 0.044715, %v748_v32  ;;  %v686_v40 = vmul.f32 %v2902_v33, %v2902_v33  ;;  %v2196_v42 = vpop.f32.mrb[14].mxu0  ;;  %v1123_v48 = vmul.f32 0.5, %v1059_v29  ;;  %v2388_v58 = vpop.eup %2387 }
  0xf4   :  { %v877_v43 = vadd.f32 %v813_v35, %v2883_v5  ;;  %v751_v44 = vmul.f32 %v687_v36, %v2897_v26  ;;  %v2911_v46 = vadd.f32 %v2196_v42, %v2814_v7  ;;  %v425_v47 = vpop.f32.mrb[15].mxu0  ;;  %2397 = vtanh.f32 %v939_v34 }
  0xf5   :  { %v876_v49 = vadd.f32 %v812_v39, %v2888_v12  ;;  %v750_v50 = vmul.f32 %v686_v40, %v2902_v33  ;;  %v2916_v51 = vadd.f32 %v2814_v7, %v425_v47  ;;  %v1122_v57 = vmul.f32 0.5, %v1058_v37 }
  0xf6   :  { %v941_v53 = vmul.f32 0.7978846, %v877_v43  ;;  %v815_v55 = vmul.f32 0.044715, %v751_v44  ;;  %v689_v56 = vmul.f32 %v2911_v46, %v2911_v46  ;;  %2399 = vtanh.f32 %v938_v38  ;;  %v2390_v0 = vpop.eup %2389 }
  0xf7   :  { %v940_v60 = vmul.f32 0.7978846, %v876_v49  ;;  %v814_v61 = vmul.f32 0.044715, %v750_v50  ;;  %v688_v62 = vmul.f32 %v2916_v51, %v2916_v51  ;;  %v2199_v63 = vpop.f32.mrb[16].mxu0  ;;  %v1186_v3 = vmul.f32 %v1122_v57, %v2820_v11  ;;  %v2392_v8 = vpop.eup %2391 }
  0xf8   :  { %v879_v1 = vadd.f32 %v815_v55, %v2897_v26  ;;  %v753_v2 = vmul.f32 %v689_v56, %v2911_v46  ;;  %v1187_v4 = vmul.f32 %v1123_v48, %v2817_v9  ;;  %v435_v6 = vpop.f32.mrb[17].mxu0  ;;  %2401 = vtanh.f32 %v941_v53 }
  0xf9   :  { %v878_v10 = vadd.f32 %v814_v61, %v2902_v33  ;;  %v752_v13 = vmul.f32 %v688_v62, %v2916_v51  ;;  %v2929_v14 = vadd.f32 %v2199_v63, %v2814_v7  ;;  %2277 = vmatprep.mubr.msk.f32.mxu1 %vm1261_vm2, %v1186_v3  ;;  %v2933_v18 = vadd.f32 %v2814_v7, %v435_v6 }
  0xfa   :  { %v943_v15 = vmul.f32 0.7978846, %v879_v1  ;;  %v817_v17 = vmul.f32 0.044715, %v753_v2  ;;  %v1060_v11 = vadd.f32 1.0, %v2388_v58  ;;  %v2935_v20 = vpop.eup %2393  ;;  %2278 = vmatmul.mubr.msk.f32.vlgmr.msra.gmra.mrb[0].mxu1 %vm1261_vm2, %v1187_v4  ;;  %v1061_v24 = vadd.f32 1.0, %v2386_v52 }
  0xfb   :  { %v942_v9 = vmul.f32 0.7978846, %v878_v10  ;;  %v816_v21 = vmul.f32 0.044715, %v752_v13  ;;  %v691_v22 = vmul.f32 %v2929_v14, %v2929_v14  ;;  %v2202_v23 = vpop.f32.mrb[18].mxu0  ;;  %2403 = vtanh.f32 %v940_v60 }
  0xfc   :  { %v881_v25 = vadd.f32 %v817_v17, %v2911_v46  ;;  %v690_v28 = vmul.f32 %v2933_v18, %v2933_v18  ;;  %v1124_v29 = vmul.f32 0.5, %v1060_v11  ;;  %v445_v31 = vpop.f32.mrb[19].mxu0  ;;  %v2396_v32 = vpop.eup %2395  ;;  %2405 = vtanh.f32 %v943_v15 }
  0xfd   :  { %v880_v34 = vadd.f32 %v816_v21, %v2916_v51  ;;  %v755_v35 = vmul.f32 %v691_v22, %v2929_v14  ;;  %v2946_v36 = vadd.f32 %v2202_v23, %v2814_v7  ;;  %v1125_v40 = vmul.f32 0.5, %v1061_v24 }
  0xfe   :  { %v945_v37 = vmul.f32 0.7978846, %v881_v25  ;;  %v754_v38 = vmul.f32 %v690_v28, %v2933_v18  ;;  %v1188_v39 = vmul.f32 %v1124_v29, %v2832_v19  ;;  %v2950_v42 = vpop.eup %2397  ;;  %2407 = vtanh.f32 %v942_v9 }
  0xff   :  { %v819_v43 = vmul.f32 0.044715, %v755_v35  ;;  %v693_v44 = vmul.f32 %v2946_v36, %v2946_v36  ;;  %v2955_v47 = vadd.f32 %v2814_v7, %v445_v31  ;;  %v2205_v48 = vpop.f32.mrb[20].mxu0  ;;  %v944_v49 = vmul.f32 0.7978846, %v880_v34 }
 0x100   :  { %v818_v50 = vmul.f32 0.044715, %v754_v38  ;;  %2280 = vmatprep.mubr.msk.f32.mxu1 %vm1261_vm2, %v1188_v39  ;;  %v1189_v52 = vmul.f32 %v1125_v40, %v2828_v16  ;;  %v1062_v53 = vadd.f32 1.0, %v2392_v8  ;;  %v455_v19 = vpop.f32.mrb[21].mxu0  ;;  %v2400_v55 = vpop.eup %2399  ;;  %2409 = vtanh.f32 %v945_v37 }
 0x101   :  { %v883_v56 = vadd.f32 %v819_v43, %v2929_v14  ;;  %v757_v57 = vmul.f32 %v693_v44, %v2946_v36  ;;  %v692_v58 = vmul.f32 %v2955_v47, %v2955_v47  ;;  %v2966_v62 = vadd.f32 %v2205_v48, %v2814_v7 }
 0x102   :  { %v882_v60 = vadd.f32 %v818_v50, %v2933_v18  ;;  %2281 = vmatmul.mubr.msk.f32.gmra.mrb[2].mxu1 %vm1261_vm2, %v1189_v52  ;;  %v1126_v61 = vmul.f32 0.5, %v1062_v53  ;;  %v1063_v16 = vadd.f32 1.0, %v2390_v0  ;;  %v2968_v63 = vpop.eup %2401  ;;  %v2972_v4 = vadd.f32 %v2814_v7, %v455_v19 }
 0x103   :  { %v947_v1 = vmul.f32 0.7978846, %v883_v56  ;;  %v821_v2 = vmul.f32 0.044715, %v757_v57  ;;  %v756_v3 = vmul.f32 %v692_v58, %v2955_v47  ;;  %v2208_v6 = vpop.f32.mrb[22].mxu0  ;;  %2411 = vtanh.f32 %v944_v49 }
 0x104   :  { %v1190_v8 = vmul.f32 %v1126_v61, %v2845_v30  ;;  %v695_v10 = vmul.f32 %v2966_v62, %v2966_v62  ;;  %v1127_v13 = vmul.f32 0.5, %v1063_v16  ;;  %v465_v15 = vpop.f32.mrb[23].mxu0  ;;  %v946_v17 = vmul.f32 0.7978846, %v882_v60 }
 0x105   :  { %v885_v0 = vadd.f32 %v821_v2, %v2946_v36  ;;  %v820_v11 = vmul.f32 0.044715, %v756_v3  ;;  %v694_v9 = vmul.f32 %v2972_v4, %v2972_v4  ;;  %v2404_v21 = vpop.eup %2403  ;;  %2413 = vtanh.f32 %v947_v1 }
 0x106   :  { %2283 = vmatprep.mubr.msk.f32.mxu1 %vm1261_vm2, %v1190_v8  ;;  %v759_v22 = vmul.f32 %v695_v10, %v2966_v62  ;;  %v1191_v30 = vmul.f32 %v1127_v13, %v2841_v27  ;;  %v1064_v23 = vadd.f32 1.0, %v2396_v32  ;;  %v2983_v24 = vpop.eup %2405  ;;  %v2988_v31 = vadd.f32 %v2208_v6, %v2814_v7 }
 0x107   :  { %v949_v25 = vmul.f32 0.7978846, %v885_v0  ;;  %v884_v28 = vadd.f32 %v820_v11, %v2955_v47  ;;  %v758_v29 = vmul.f32 %v694_v9, %v2972_v4  ;;  %v2211_v34 = vpop.f32.mrb[24].mxu0  ;;  %v1065_v38 = vadd.f32 1.0, %v2935_v20 }
 0x108   :  { %v823_v35 = vmul.f32 0.044715, %v759_v22  ;;  %2284 = vmatmul.mubr.msk.f32.gmra.mrb[4].mxu1 %vm1261_vm2, %v1191_v30  ;;  %v1128_v37 = vmul.f32 0.5, %v1064_v23  ;;  %v2993_v27 = vadd.f32 %v2814_v7, %v465_v15  ;;  %v475_v32 = vpop.f32.mrb[25].mxu0  ;;  %v2995_v39 = vpop.eup %2407  ;;  %2415 = vtanh.f32 %v946_v17 }
 0x109   :  { %v948_v40 = vmul.f32 0.7978846, %v884_v28  ;;  %v822_v43 = vmul.f32 0.044715, %v758_v29  ;;  %v697_v44 = vmul.f32 %v2988_v31, %v2988_v31  ;;  %v1129_v50 = vmul.f32 0.5, %v1065_v38 }
 0x10a   :  { %v887_v48 = vadd.f32 %v823_v35, %v2966_v62  ;;  %v1192_v49 = vmul.f32 %v1128_v37, %v2860_v45  ;;  %v696_v20 = vmul.f32 %v2993_v27, %v2993_v27  ;;  %v3003_v52 = vpop.eup %2409  ;;  %2417 = vtanh.f32 %v949_v25 }
 0x10b   :  { %v886_v53 = vadd.f32 %v822_v43, %v2972_v4  ;;  %v761_v19 = vmul.f32 %v697_v44, %v2988_v31  ;;  %v1066_v56 = vadd.f32 1.0, %v2400_v55  ;;  %v2214_v57 = vpop.f32.mrb[26].mxu0  ;;  %v1193_v60 = vmul.f32 %v1129_v50, %v2855_v41 }
 0x10c   :  { %v951_v58 = vmul.f32 0.7978846, %v887_v48  ;;  %2286 = vmatprep.mubr.msk.f32.mxu1 %vm1261_vm2, %v1192_v49  ;;  %v760_v45 = vmul.f32 %v696_v20, %v2993_v27  ;;  %v3011_v61 = vadd.f32 %v2211_v34, %v2814_v7  ;;  %v485_v16 = vpop.f32.mrb[27].mxu0  ;;  %2419 = vtanh.f32 %v948_v40 }
 0x10d   :  { %v825_v1 = vmul.f32 0.044715, %v761_v19  ;;  %v1130_v2 = vmul.f32 0.5, %v1066_v56  ;;  %v1067_v3 = vadd.f32 1.0, %v2950_v42  ;;  %v3014_v6 = vpop.eup %2411  ;;  %v950_v55 = vmul.f32 0.7978846, %v886_v53  ;;  %2287 = vmatmul.mubr.msk.f32.gmra.mrb[6].mxu1 %vm1261_vm2, %v1193_v60 }
 0x10e   :  { %v824_v8 = vmul.f32 0.044715, %v760_v45  ;;  %v699_v41 = vmul.f32 %v3011_v61, %v3011_v61  ;;  %v3020_v10 = vadd.f32 %v2814_v7, %v475_v32  ;;  %2421 = vtanh.f32 %v951_v58 }
 0x10f   :  { %v889_v13 = vadd.f32 %v825_v1, %v2988_v31  ;;  %v1194_v15 = vmul.f32 %v1130_v2, %v2874_v59  ;;  %v1131_v17 = vmul.f32 0.5, %v1067_v3  ;;  %v2217_v0 = vpop.f32.mrb[28].mxu0  ;;  %v3024_v42 = vpop.eup %2413  ;;  %v1068_v30 = vadd.f32 1.0, %v2404_v21 }
 0x110   :  { %v888_v11 = vadd.f32 %v824_v8, %v2993_v27  ;;  %v763_v9 = vmul.f32 %v699_v41, %v3011_v61  ;;  %v698_v22 = vmul.f32 %v3020_v10, %v3020_v10  ;;  %v495_v23 = vpop.f32.mrb[29].mxu0  ;;  %v3033_v59 = vadd.f32 %v2214_v57, %v2814_v7 }
 0x111   :  { %v953_v25 = vmul.f32 0.7978846, %v889_v13  ;;  %2289 = vmatprep.mubr.msk.f32.mxu1 %vm1261_vm2, %v1194_v15  ;;  %v1195_v28 = vmul.f32 %v1131_v17, %v2869_v54  ;;  %v1069_v29 = vadd.f32 1.0, %v2968_v63  ;;  %2423 = vtanh.f32 %v950_v55 }
 0x112   :  { %v827_v34 = vmul.f32 0.044715, %v763_v9  ;;  %v762_v35 = vmul.f32 %v698_v22, %v3020_v10  ;;  %v1132_v37 = vmul.f32 0.5, %v1068_v30  ;;  %v3037_v38 = vpop.eup %2415  ;;  %v952_v32 = vmul.f32 0.7978846, %v888_v11 }
 0x113   :  { %2290 = vmatmul.mubr.msk.f32.gmra.mrb[8].mxu1 %vm1261_vm2, %v1195_v28  ;;  %v701_v21 = vmul.f32 %v3033_v59, %v3033_v59  ;;  %v1133_v40 = vmul.f32 0.5, %v1069_v29  ;;  %v3043_v54 = vadd.f32 %v2814_v7, %v485_v16  ;;  %v2220_v43 = vpop.f32.mrb[30].mxu0  ;;  %2425 = vtanh.f32 %v953_v25 }
 0x114   :  { %v891_v63 = vadd.f32 %v827_v34, %v3011_v61  ;;  %v826_v44 = vmul.f32 0.044715, %v762_v35  ;;  %v1196_v48 = vmul.f32 %v1132_v37, %v2888_v12  ;;  %v505_v49 = vpop.f32.mrb[31].mxu0  ;;  %v3047_v50 = vpop.eup %2417  ;;  %v1070_v56 = vadd.f32 1.0, %v2995_v39 }
 0x115   :  { %v765_v20 = vmul.f32 %v701_v21, %v3033_v59  ;;  %v1197_v53 = vmul.f32 %v1133_v40, %v2883_v5  ;;  %v700_v19 = vmul.f32 %v3043_v54, %v3043_v54  ;;  %v3057_v60 = vadd.f32 %v2217_v0, %v2814_v7 }
 0x116   :  { %v955_v57 = vmul.f32 0.7978846, %v891_v63  ;;  %v890_v58 = vadd.f32 %v826_v44, %v3020_v10  ;;  %2292 = vmatprep.mubr.msk.f32.mxu1 %vm1261_vm2, %v1196_v48  ;;  %v1071_v12 = vadd.f32 1.0, %v2983_v24  ;;  %v3060_v45 = vpop.eup %2419  ;;  %v1134_v1 = vmul.f32 0.5, %v1070_v56 }
 0x117   :  { %v829_v16 = vmul.f32 0.044715, %v765_v20  ;;  %2293 = vmatmul.mubr.msk.f32.gmra.mrb[10].mxu1 %vm1261_vm2, %v1197_v53  ;;  %v764_v5 = vmul.f32 %v700_v19, %v3043_v54  ;;  %v3065_v39 = vadd.f32 %v2814_v7, %v495_v23  ;;  %v2223_v2 = vpop.f32.mrb[32].mxu0  ;;  %2427 = vtanh.f32 %v952_v32 }
 0x118   :  { %v954_v3 = vmul.f32 0.7978846, %v890_v58  ;;  %v703_v55 = vmul.f32 %v3057_v60, %v3057_v60  ;;  %v1135_v8 = vmul.f32 0.5, %v1071_v12  ;;  %v515_v41 = vpop.f32.mrb[33].mxu0  ;;  %v3069_v24 = vpop.eup %2421  ;;  %v1198_v17 = vmul.f32 %v1134_v1, %v2902_v33 }
 0x119   :  { %v893_v13 = vadd.f32 %v829_v16, %v3033_v59  ;;  %v828_v15 = vmul.f32 0.044715, %v764_v5  ;;  %v702_v0 = vmul.f32 %v3065_v39, %v3065_v39  ;;  %2429 = vtanh.f32 %v955_v57 }
 0x11a   :  { %v767_v11 = vmul.f32 %v703_v55, %v3057_v60  ;;  %v1199_v9 = vmul.f32 %v1135_v8, %v2897_v26  ;;  %v1072_v22 = vadd.f32 1.0, %v3014_v6  ;;  %2295 = vmatprep.mubr.msk.f32.mxu1 %vm1261_vm2, %v1198_v17  ;;  %v3082_v28 = vadd.f32 %v2220_v43, %v2814_v7 }
 0x11b   :  { %v957_v30 = vmul.f32 0.7978846, %v893_v13  ;;  %v892_v23 = vadd.f32 %v828_v15, %v3043_v54  ;;  %v766_v25 = vmul.f32 %v702_v0, %v3065_v39  ;;  %v2226_v33 = vpop.f32.mrb[34].mxu0  ;;  %v3084_v29 = vpop.eup %2423  ;;  %v1073_v26 = vadd.f32 1.0, %v3003_v52 }
 0x11c   :  { %v831_v34 = vmul.f32 0.044715, %v767_v11  ;;  %2296 = vmatmul.mubr.msk.f32.gmra.mrb[12].mxu1 %vm1261_vm2, %v1199_v9  ;;  %v1136_v35 = vmul.f32 0.5, %v1072_v22  ;;  %v3089_v6 = vadd.f32 %v2814_v7, %v505_v49  ;;  %v525_v37 = vpop.f32.mrb[35].mxu0  ;;  %2431 = vtanh.f32 %v954_v3 }
 0x11d   :  { %v956_v32 = vmul.f32 0.7978846, %v892_v23  ;;  %v830_v21 = vmul.f32 0.044715, %v766_v25  ;;  %v705_v40 = vmul.f32 %v3082_v28, %v3082_v28  ;;  %v3093_v43 = vpop.eup %2425  ;;  %v1137_v48 = vmul.f32 0.5, %v1073_v26 }
 0x11e   :  { %v895_v63 = vadd.f32 %v831_v34, %v3057_v60  ;;  %v1200_v44 = vmul.f32 %v1136_v35, %v2916_v51  ;;  %v704_v52 = vmul.f32 %v3089_v6, %v3089_v6  ;;  %2433 = vtanh.f32 %v957_v30 }
 0x11f   :  { %v894_v49 = vadd.f32 %v830_v21, %v3065_v39  ;;  %v769_v20 = vmul.f32 %v705_v40, %v3082_v28  ;;  %v1074_v53 = vadd.f32 1.0, %v3037_v38  ;;  %v2229_v19 = vpop.f32.mrb[36].mxu0  ;;  %v1201_v57 = vmul.f32 %v1137_v48, %v2911_v46 }
 0x120   :  { %v959_v56 = vmul.f32 0.7978846, %v895_v63  ;;  %2298 = vmatprep.mubr.msk.f32.mxu1 %vm1261_vm2, %v1200_v44  ;;  %v768_v58 = vmul.f32 %v704_v52, %v3089_v6  ;;  %v3106_v51 = vadd.f32 %v2223_v2, %v2814_v7  ;;  %v535_v12 = vpop.f32.mrb[37].mxu0  ;;  %2435 = vtanh.f32 %v956_v32 }
 0x121   :  { %v833_v16 = vmul.f32 0.044715, %v769_v20  ;;  %v1138_v5 = vmul.f32 0.5, %v1074_v53  ;;  %v1075_v1 = vadd.f32 1.0, %v3024_v42  ;;  %v3109_v3 = vpop.eup %2427  ;;  %v958_v38 = vmul.f32 0.7978846, %v894_v49  ;;  %2299 = vmatmul.mubr.msk.f32.gmra.mrb[14].mxu1 %vm1261_vm2, %v1201_v57 }
 0x122   :  { %v832_v55 = vmul.f32 0.044715, %v768_v58  ;;  %v707_v46 = vmul.f32 %v3106_v51, %v3106_v51  ;;  %v3115_v8 = vadd.f32 %v2814_v7, %v515_v41  ;;  %2437 = vtanh.f32 %v959_v56 }
 0x123   :  { %v897_v2 = vadd.f32 %v833_v16, %v3082_v28  ;;  %v1202_v13 = vmul.f32 %v1138_v5, %v2933_v18  ;;  %v1139_v15 = vmul.f32 0.5, %v1075_v1  ;;  %v3119_v17 = vpop.f32.mrb[38].mxu0  ;;  %v3121_v42 = vpop.eup %2429  ;;  %v1076_v41 = vadd.f32 1.0, %v3060_v45 }
 0x124   :  { %v896_v0 = vadd.f32 %v832_v55, %v3089_v6  ;;  %v771_v11 = vmul.f32 %v707_v46, %v3106_v51  ;;  %v706_v9 = vmul.f32 %v3115_v8, %v3115_v8  ;;  %v3128_v22 = vpop.f32.mrb[39].mxu0  ;;  %v3133_v23 = vadd.f32 %v2226_v33, %v2814_v7 }
 0x125   :  { %v961_v30 = vmul.f32 0.7978846, %v897_v2  ;;  %2301 = vmatprep.mubr.msk.f32.mxu1 %vm1261_vm2, %v1202_v13  ;;  %v1203_v18 = vmul.f32 %v1139_v15, %v2929_v14  ;;  %v1077_v25 = vadd.f32 1.0, %v3047_v50  ;;  %2439 = vtanh.f32 %v958_v38 }
 0x126   :  { %v835_v34 = vmul.f32 0.044715, %v771_v11  ;;  %v770_v35 = vmul.f32 %v706_v9, %v3115_v8  ;;  %v1140_v26 = vmul.f32 0.5, %v1076_v41  ;;  %v3137_v32 = vpop.eup %2431  ;;  %v960_v45 = vmul.f32 0.7978846, %v896_v0 }
 0x127   :  { %2302 = vmatmul.mubr.msk.f32.gmra.mrb[16].mxu1 %vm1261_vm2, %v1203_v18  ;;  %v709_v21 = vmul.f32 %v3133_v23, %v3133_v23  ;;  %v1141_v40 = vmul.f32 0.5, %v1077_v25  ;;  %v3143_v14 = vadd.f32 %v2814_v7, %v525_v37  ;;  %v3145_v33 = vpop.f32.mrb[40].mxu0  ;;  %2441 = vtanh.f32 %v961_v30 }
 0x128   :  { %v899_v50 = vadd.f32 %v835_v34, %v3106_v51  ;;  %v834_v63 = vmul.f32 0.044715, %v770_v35  ;;  %v1204_v44 = vmul.f32 %v1140_v26, %v2955_v47  ;;  %v3149_v48 = vpop.f32.mrb[41].mxu0  ;;  %v3151_v52 = vpop.eup %2433  ;;  %v1078_v53 = vadd.f32 1.0, %v3084_v29 }
 0x129   :  { %v773_v49 = vmul.f32 %v709_v21, %v3133_v23  ;;  %v1205_v20 = vmul.f32 %v1141_v40, %v2946_v36  ;;  %v708_v37 = vmul.f32 %v3143_v14, %v3143_v14  ;;  %v3161_v47 = vadd.f32 %v2229_v19, %v2814_v7 }
 0x12a   :  { %v963_v56 = vmul.f32 0.7978846, %v899_v50  ;;  %v898_v57 = vadd.f32 %v834_v63, %v3115_v8  ;;  %2304 = vmatprep.mubr.msk.f32.mxu1 %vm1261_vm2, %v1204_v44  ;;  %v1079_v58 = vadd.f32 1.0, %v3069_v24  ;;  %v3164_v16 = vpop.eup %2435  ;;  %v1142_v1 = vmul.f32 0.5, %v1078_v53 }
 0x12b   :  { %v837_v5 = vmul.f32 0.044715, %v773_v49  ;;  %2305 = vmatmul.mubr.msk.f32.gmra.mrb[18].mxu1 %vm1261_vm2, %v1205_v20  ;;  %v772_v36 = vmul.f32 %v708_v37, %v3143_v14  ;;  %v3169_v29 = vadd.f32 %v2814_v7, %v535_v12  ;;  %v3171_v38 = vpop.f32.mrb[42].mxu0  ;;  %2443 = vtanh.f32 %v960_v45 }
 0x12c   :  { %v962_v55 = vmul.f32 0.7978846, %v898_v57  ;;  %v711_v19 = vmul.f32 %v3161_v47, %v3161_v47  ;;  %v1143_v46 = vmul.f32 0.5, %v1079_v58  ;;  %v3175_v24 = vpop.f32.mrb[43].mxu0  ;;  %v3177_v2 = vpop.eup %2437  ;;  %v1206_v0 = vmul.f32 %v1142_v1, %v2972_v4 }
 0x12d   :  { %v901_v13 = vadd.f32 %v837_v5, %v3133_v23  ;;  %v836_v15 = vmul.f32 0.044715, %v772_v36  ;;  %v710_v12 = vmul.f32 %v3169_v29, %v3169_v29  ;;  %2445 = vtanh.f32 %v963_v56 }
 0x12e   :  { %v775_v11 = vmul.f32 %v711_v19, %v3161_v47  ;;  %v1207_v9 = vmul.f32 %v1143_v46, %v2966_v62  ;;  %v1080_v41 = vadd.f32 1.0, %v3109_v3  ;;  %2307 = vmatprep.mubr.msk.f32.mxu1 %vm1261_vm2, %v1206_v0  ;;  %v3191_v4 = vadd.f32 %v3119_v17, %v2814_v7 }
 0x12f   :  { %v965_v30 = vmul.f32 0.7978846, %v901_v13  ;;  %v900_v18 = vadd.f32 %v836_v15, %v3143_v14  ;;  %v774_v25 = vmul.f32 %v710_v12, %v3169_v29  ;;  %v3193_v34 = vpop.f32.mrb[44].mxu0  ;;  %v3195_v35 = vpop.eup %2439  ;;  %v1081_v3 = vadd.f32 1.0, %v3093_v43 }
 0x130   :  { %v839_v26 = vmul.f32 0.044715, %v775_v11  ;;  %2308 = vmatmul.mubr.msk.f32.gmra.mrb[20].mxu1 %vm1261_vm2, %v1207_v9  ;;  %v1144_v62 = vmul.f32 0.5, %v1080_v41  ;;  %v3201_v45 = vadd.f32 %v2814_v7, %v3128_v22  ;;  %v3203_v21 = vpop.f32.mrb[45].mxu0  ;;  %2447 = vtanh.f32 %v962_v55 }
 0x131   :  { %v964_v40 = vmul.f32 0.7978846, %v900_v18  ;;  %v838_v17 = vmul.f32 0.044715, %v774_v25  ;;  %v713_v50 = vmul.f32 %v3191_v4, %v3191_v4  ;;  %v3207_v63 = vpop.eup %2441  ;;  %v1145_v20 = vmul.f32 0.5, %v1081_v3 }
 0x132   :  { %v903_v44 = vadd.f32 %v839_v26, %v3161_v47  ;;  %v1208_v49 = vmul.f32 %v1144_v62, %v2993_v27  ;;  %v712_v43 = vmul.f32 %v3201_v45, %v3201_v45  ;;  %2449 = vtanh.f32 %v965_v30 }
 0x133   :  { %v902_v22 = vadd.f32 %v838_v17, %v3169_v29  ;;  %v777_v37 = vmul.f32 %v713_v50, %v3191_v4  ;;  %v1082_v53 = vadd.f32 1.0, %v3137_v32  ;;  %v3216_v56 = vpop.f32.mrb[46].mxu0  ;;  %v1209_v58 = vmul.f32 %v1145_v20, %v2988_v31 }
 0x134   :  { %v967_v57 = vmul.f32 0.7978846, %v903_v44  ;;  %2310 = vmatprep.mubr.msk.f32.mxu1 %vm1261_vm2, %v1208_v49  ;;  %v776_v27 = vmul.f32 %v712_v43, %v3201_v45  ;;  %v3223_v5 = vadd.f32 %v3145_v33, %v2814_v7  ;;  %v3225_v36 = vpop.f32.mrb[47].mxu0  ;;  %2451 = vtanh.f32 %v964_v40 }
 0x135   :  { %v841_v1 = vmul.f32 0.044715, %v777_v37  ;;  %v1146_v55 = vmul.f32 0.5, %v1082_v53  ;;  %v1083_v32 = vadd.f32 1.0, %v3121_v42  ;;  %v3228_v19 = vpop.eup %2443  ;;  %v966_v46 = vmul.f32 0.7978846, %v902_v22  ;;  %2311 = vmatmul.mubr.msk.f32.gmra.mrb[22].mxu1 %vm1261_vm2, %v1209_v58 }
 0x136   :  { %v840_v13 = vmul.f32 0.044715, %v776_v27  ;;  %v715_v31 = vmul.f32 %v3223_v5, %v3223_v5  ;;  %v3235_v33 = vadd.f32 %v2814_v7, %v3149_v48  ;;  %2453 = vtanh.f32 %v967_v57 }
 0x137   :  { %v905_v15 = vadd.f32 %v841_v1, %v3191_v4  ;;  %v1210_v0 = vmul.f32 %v1146_v55, %v3020_v10  ;;  %v1147_v12 = vmul.f32 0.5, %v1083_v32  ;;  %v3239_v42 = vpop.f32.mrb[48].mxu0  ;;  %v3241_v11 = vpop.eup %2445  ;;  %v1084_v48 = vadd.f32 1.0, %v3164_v16 }
 0x138   :  { %v904_v9 = vadd.f32 %v840_v13, %v3201_v45  ;;  %v779_v41 = vmul.f32 %v715_v31, %v3223_v5  ;;  %v714_v30 = vmul.f32 %v3235_v33, %v3235_v33  ;;  %v3248_v18 = vpop.f32.mrb[49].mxu0  ;;  %v3254_v26 = vadd.f32 %v3171_v38, %v2814_v7 }
 0x139   :  { %v969_v25 = vmul.f32 0.7978846, %v905_v15  ;;  %2313 = vmatprep.mubr.msk.f32.mxu1 %vm1261_vm2, %v1210_v0  ;;  %v1211_v10 = vmul.f32 %v1147_v12, %v3011_v61  ;;  %v1085_v62 = vadd.f32 1.0, %v3151_v52  ;;  %2455 = vtanh.f32 %v966_v46 }
 0x13a   :  { %v843_v3 = vmul.f32 0.044715, %v779_v41  ;;  %v778_v40 = vmul.f32 %v714_v30, %v3235_v33  ;;  %v1148_v17 = vmul.f32 0.5, %v1084_v48  ;;  %v3258_v50 = vpop.eup %2447  ;;  %v968_v16 = vmul.f32 0.7978846, %v904_v9 }
 0x13b   :  { %2314 = vmatmul.mubr.msk.f32.gmra.mrb[24].mxu1 %vm1261_vm2, %v1211_v10  ;;  %v717_v44 = vmul.f32 %v3254_v26, %v3254_v26  ;;  %v1149_v61 = vmul.f32 0.5, %v1085_v62  ;;  %v3265_v38 = vadd.f32 %v2814_v7, %v3175_v24  ;;  %v3267_v49 = vpop.f32.mrb[50].mxu0  ;;  %2457 = vtanh.f32 %v969_v25 }
 0x13c   :  { %v907_v52 = vadd.f32 %v843_v3, %v3223_v5  ;;  %v842_v20 = vmul.f32 0.044715, %v778_v40  ;;  %v1212_v43 = vmul.f32 %v1148_v17, %v3043_v54  ;;  %v3271_v22 = vpop.f32.mrb[51].mxu0  ;;  %v3273_v37 = vpop.eup %2449  ;;  %v1086_v58 = vadd.f32 1.0, %v3195_v35 }
 0x13d   :  { %v781_v53 = vmul.f32 %v717_v44, %v3254_v26  ;;  %v1213_v57 = vmul.f32 %v1149_v61, %v3033_v59  ;;  %v716_v24 = vmul.f32 %v3265_v38, %v3265_v38  ;;  %v3284_v54 = vadd.f32 %v3193_v34, %v2814_v7 }
 0x13e   :  { %v971_v27 = vmul.f32 0.7978846, %v907_v52  ;;  %v906_v1 = vadd.f32 %v842_v20, %v3235_v33  ;;  %2316 = vmatprep.mubr.msk.f32.mxu1 %vm1261_vm2, %v1212_v43  ;;  %v1087_v55 = vadd.f32 1.0, %v3177_v2  ;;  %v3287_v32 = vpop.eup %2451  ;;  %v1150_v13 = vmul.f32 0.5, %v1086_v58 }
 0x13f   :  { %v845_v46 = vmul.f32 0.044715, %v781_v53  ;;  %2317 = vmatmul.mubr.msk.f32.gmra.mrb[26].mxu1 %vm1261_vm2, %v1213_v57  ;;  %v780_v59 = vmul.f32 %v716_v24, %v3265_v38  ;;  %v3293_v35 = vadd.f32 %v2814_v7, %v3203_v21  ;;  %v3295_v31 = vpop.f32.mrb[52].mxu0  ;;  %2459 = vtanh.f32 %v968_v16 }
 0x140   :  { %v970_v15 = vmul.f32 0.7978846, %v906_v1  ;;  %v719_v34 = vmul.f32 %v3284_v54, %v3284_v54  ;;  %v1151_v2 = vmul.f32 0.5, %v1087_v55  ;;  %v3299_v0 = vpop.f32.mrb[53].mxu0  ;;  %v3301_v12 = vpop.eup %2453  ;;  %v1214_v30 = vmul.f32 %v1150_v13, %v3065_v39  ;;  %v3316_v39 = vld [vmem:[%s3923_s2] ss:$0 sm:$0xff] }
 0x141   :  { %v909_v9 = vadd.f32 %v845_v46, %v3254_v26  ;;  %v844_v41 = vmul.f32 0.044715, %v780_v59  ;;  %v718_v7 = vmul.f32 %v3293_v35, %v3293_v35  ;;  %2461 = vtanh.f32 %v971_v27 }
 0x142   :  { %v783_v21 = vmul.f32 %v719_v34, %v3284_v54  ;;  %v1215_v48 = vmul.f32 %v1151_v2, %v3057_v60  ;;  %v1088_v25 = vadd.f32 1.0, %v3228_v19  ;;  %2319 = vmatprep.mubr.msk.f32.mxu1 %vm1261_vm2, %v1214_v30  ;;  %v3320_v40 = vadd.f32 %v3316_v39, %v3216_v56 }
 0x143   :  { %v973_v10 = vmul.f32 0.7978846, %v909_v9  ;;  %v908_v62 = vadd.f32 %v844_v41, %v3265_v38  ;;  %v782_v3 = vmul.f32 %v718_v7, %v3293_v35  ;;  %v3322_v17 = vpop.f32.mrb[54].mxu0  ;;  %v3324_v60 = vpop.eup %2455  ;;  %v1089_v44 = vadd.f32 1.0, %v3207_v63 }
 0x144   :  { %v847_v19 = vmul.f32 0.044715, %v783_v21  ;;  %2320 = vmatmul.mubr.msk.f32.gmra.mrb[28].mxu1 %vm1261_vm2, %v1215_v48  ;;  %v1152_v16 = vmul.f32 0.5, %v1088_v25  ;;  %v3330_v61 = vadd.f32 %v3316_v39, %v3225_v36  ;;  %v3332_v52 = vpop.f32.mrb[55].mxu0  ;;  %2463 = vtanh.f32 %v970_v15 }
 0x145   :  { %v972_v20 = vmul.f32 0.7978846, %v908_v62  ;;  %v846_v56 = vmul.f32 0.044715, %v782_v3  ;;  %v721_v43 = vmul.f32 %v3320_v40, %v3320_v40  ;;  %v3336_v53 = vpop.eup %2457  ;;  %v1153_v58 = vmul.f32 0.5, %v1089_v44 }
 0x146   :  { %v911_v57 = vadd.f32 %v847_v19, %v3284_v54  ;;  %v1216_v24 = vmul.f32 %v1152_v16, %v3089_v6  ;;  %v720_v63 = vmul.f32 %v3330_v61, %v3330_v61  ;;  %2465 = vtanh.f32 %v973_v10 }
 0x147   :  { %v910_v36 = vadd.f32 %v846_v56, %v3293_v35  ;;  %v785_v27 = vmul.f32 %v721_v43, %v3320_v40  ;;  %v1090_v1 = vadd.f32 1.0, %v3258_v50  ;;  %v3345_v55 = vpop.f32.mrb[56].mxu0  ;;  %v1217_v59 = vmul.f32 %v1153_v58, %v3082_v28 }
 0x148   :  { %v975_v46 = vmul.f32 0.7978846, %v911_v57  ;;  %2322 = vmatprep.mubr.msk.f32.mxu1 %vm1261_vm2, %v1216_v24  ;;  %v784_v6 = vmul.f32 %v720_v63, %v3330_v61  ;;  %v3352_v13 = vadd.f32 %v3316_v39, %v3239_v42  ;;  %v3354_v15 = vpop.f32.mrb[57].mxu0  ;;  %2467 = vtanh.f32 %v972_v20 }
 0x149   :  { %v849_v34 = vmul.f32 0.044715, %v785_v27  ;;  %v1154_v2 = vmul.f32 0.5, %v1090_v1  ;;  %v1091_v50 = vadd.f32 1.0, %v3241_v11  ;;  %v3357_v9 = vpop.eup %2459  ;;  %v974_v41 = vmul.f32 0.7978846, %v910_v36  ;;  %2323 = vmatmul.mubr.msk.f32.gmra.mrb[30].mxu1 %vm1261_vm2, %v1217_v59 }
 0x14a   :  { %v848_v30 = vmul.f32 0.044715, %v784_v6  ;;  %v723_v28 = vmul.f32 %v3352_v13, %v3352_v13  ;;  %v3364_v42 = vadd.f32 %v3316_v39, %v3248_v18  ;;  %2469 = vtanh.f32 %v975_v46 }
 0x14b   :  { %v913_v7 = vadd.f32 %v849_v34, %v3320_v40  ;;  %v1218_v21 = vmul.f32 %v1154_v2, %v3115_v8  ;;  %v1155_v48 = vmul.f32 0.5, %v1091_v50  ;;  %v3368_v11 = vpop.f32.mrb[58].mxu0  ;;  %v3370_v25 = vpop.eup %2461  ;;  %v1092_v18 = vadd.f32 1.0, %v3287_v32 }
 0x14c   :  { %v912_v10 = vadd.f32 %v848_v30, %v3330_v61  ;;  %v787_v62 = vmul.f32 %v723_v28, %v3352_v13  ;;  %v722_v3 = vmul.f32 %v3364_v42, %v3364_v42  ;;  %v3377_v19 = vpop.f32.mrb[59].mxu0  ;;  %v3383_v44 = vadd.f32 %v3316_v39, %v3267_v49 }
 0x14d   :  { %v977_v16 = vmul.f32 0.7978846, %v913_v7  ;;  %2325 = vmatprep.mubr.msk.f32.mxu1 %vm1261_vm2, %v1218_v21  ;;  %v1219_v8 = vmul.f32 %v1155_v48, %v3106_v51  ;;  %v1093_v20 = vadd.f32 1.0, %v3273_v37  ;;  %2471 = vtanh.f32 %v974_v41 }
 0x14e   :  { %v851_v56 = vmul.f32 0.044715, %v787_v62  ;;  %v786_v43 = vmul.f32 %v722_v3, %v3364_v42  ;;  %v1156_v57 = vmul.f32 0.5, %v1092_v18  ;;  %v3387_v24 = vpop.eup %2463  ;;  %v976_v32 = vmul.f32 0.7978846, %v912_v10 }
 0x14f   :  { %2326 = vmatmul.mubr.msk.f32.gmra.mrb[32].mxu1 %vm1261_vm2, %v1219_v8  ;;  %v725_v58 = vmul.f32 %v3383_v44, %v3383_v44  ;;  %v1157_v51 = vmul.f32 0.5, %v1093_v20  ;;  %v3394_v49 = vadd.f32 %v3316_v39, %v3271_v22  ;;  %v3396_v63 = vpop.f32.mrb[60].mxu0  ;;  %2473 = vtanh.f32 %v977_v16 }
 0x150   :  { %v915_v37 = vadd.f32 %v851_v56, %v3352_v13  ;;  %v850_v36 = vmul.f32 0.044715, %v786_v43  ;;  %v1220_v27 = vmul.f32 %v1156_v57, %v3143_v14  ;;  %v3400_v1 = vpop.f32.mrb[61].mxu0  ;;  %v3402_v46 = vpop.eup %2465  ;;  %v1094_v34 = vadd.f32 1.0, %v3324_v60 }
 0x151   :  { %v789_v59 = vmul.f32 %v725_v58, %v3383_v44  ;;  %v1221_v6 = vmul.f32 %v1157_v51, %v3133_v23  ;;  %v724_v22 = vmul.f32 %v3394_v49, %v3394_v49  ;;  %v3413_v14 = vadd.f32 %v3316_v39, %v3295_v31 }
 0x152   :  { %v979_v2 = vmul.f32 0.7978846, %v915_v37  ;;  %v914_v50 = vadd.f32 %v850_v36, %v3364_v42  ;;  %2328 = vmatprep.mubr.msk.f32.mxu1 %vm1261_vm2, %v1220_v27  ;;  %v1095_v41 = vadd.f32 1.0, %v3301_v12  ;;  %v3416_v30 = vpop.eup %2467  ;;  %v1158_v7 = vmul.f32 0.5, %v1094_v34 }
 0x153   :  { %v853_v28 = vmul.f32 0.044715, %v789_v59  ;;  %2329 = vmatmul.mubr.msk.f32.gmra.mrb[34].mxu1 %vm1261_vm2, %v1221_v6  ;;  %v788_v23 = vmul.f32 %v724_v22, %v3394_v49  ;;  %v3422_v60 = vadd.f32 %v3316_v39, %v3299_v0  ;;  %v3424_v21 = vpop.f32.mrb[62].mxu0  ;;  %2475 = vtanh.f32 %v976_v32 }
 0x154   :  { %v978_v48 = vmul.f32 0.7978846, %v914_v50  ;;  %v727_v31 = vmul.f32 %v3413_v14, %v3413_v14  ;;  %v1159_v12 = vmul.f32 0.5, %v1095_v41  ;;  %v3428_v10 = vpop.f32.mrb[63].mxu0  ;;  %v3430_v62 = vpop.eup %2469  ;;  %v1222_v16 = vmul.f32 %v1158_v7, %v3169_v29 }
 0x155   :  { %v917_v3 = vadd.f32 %v853_v28, %v3383_v44  ;;  %v852_v18 = vmul.f32 0.044715, %v788_v23  ;;  %v726_v0 = vmul.f32 %v3422_v60, %v3422_v60  ;;  %2477 = vtanh.f32 %v979_v2 }
 0x156   :  { %v791_v8 = vmul.f32 %v727_v31, %v3413_v14  ;;  %v1223_v20 = vmul.f32 %v1159_v12, %v3161_v47  ;;  %v1096_v56 = vadd.f32 1.0, %v3357_v9  ;;  %2331 = vmatprep.mubr.msk.f32.mxu1 %vm1261_vm2, %v1222_v16  ;;  %v3444_v29 = vadd.f32 %v3316_v39, %v3322_v17 }
 0x157   :  { %v981_v43 = vmul.f32 0.7978846, %v917_v3  ;;  %v916_v57 = vadd.f32 %v852_v18, %v3394_v49  ;;  %v790_v32 = vmul.f32 %v726_v0, %v3422_v60  ;;  %v3446_v58 = vpop.eup %2471  ;;  %v1097_v47 = vadd.f32 1.0, %v3336_v53 }
 0x158   :  { %v855_v51 = vmul.f32 0.044715, %v791_v8  ;;  %2332 = vmatmul.mubr.msk.f32.gmra.mrb[36].mxu1 %vm1261_vm2, %v1223_v20  ;;  %v1160_v37 = vmul.f32 0.5, %v1096_v56  ;;  %v3452_v9 = vadd.f32 %v3316_v39, %v3332_v52  ;;  %2479 = vtanh.f32 %v978_v48 }
 0x159   :  { %v980_v36 = vmul.f32 0.7978846, %v916_v57  ;;  %v854_v27 = vmul.f32 0.044715, %v790_v32  ;;  %v729_v59 = vmul.f32 %v3444_v29, %v3444_v29  ;;  %v3456_v17 = vpop.eup %2473  ;;  %v1161_v34 = vmul.f32 0.5, %v1097_v47 }
 0x15a   :  { %v919_v6 = vadd.f32 %v855_v51, %v3413_v14  ;;  %v1224_v22 = vmul.f32 %v1160_v37, %v3201_v45  ;;  %v728_v53 = vmul.f32 %v3452_v9, %v3452_v9  ;;  %2481 = vtanh.f32 %v981_v43 }
 0x15b   :  { %v918_v52 = vadd.f32 %v854_v27, %v3422_v60  ;;  %v793_v2 = vmul.f32 %v729_v59, %v3444_v29  ;;  %v1098_v50 = vadd.f32 1.0, %v3387_v24  ;;  %v1225_v28 = vmul.f32 %v1161_v34, %v3191_v4 }
 0x15c   :  { %v983_v41 = vmul.f32 0.7978846, %v919_v6  ;;  %2334 = vmatprep.mubr.msk.f32.mxu1 %vm1261_vm2, %v1224_v22  ;;  %v792_v23 = vmul.f32 %v728_v53, %v3452_v9  ;;  %v3470_v45 = vadd.f32 %v3316_v39, %v3345_v55  ;;  %2483 = vtanh.f32 %v980_v36 }
 0x15d   :  { %v857_v7 = vmul.f32 0.044715, %v793_v2  ;;  %v1162_v48 = vmul.f32 0.5, %v1098_v50  ;;  %v1099_v31 = vadd.f32 1.0, %v3370_v25  ;;  %v2476_v12 = vpop.eup %2475  ;;  %v982_v3 = vmul.f32 0.7978846, %v918_v52  ;;  %2335 = vmatmul.mubr.msk.f32.gmra.mrb[38].mxu1 %vm1261_vm2, %v1225_v28 }
 0x15e   :  { %v856_v24 = vmul.f32 0.044715, %v792_v23  ;;  %v731_v18 = vmul.f32 %v3470_v45, %v3470_v45  ;;  %v3478_v4 = vadd.f32 %v3316_v39, %v3354_v15  ;;  %2485 = vtanh.f32 %v983_v41 }
 0x15f   :  { %v921_v55 = vadd.f32 %v857_v7, %v3444_v29  ;;  %v1226_v16 = vmul.f32 %v1162_v48, %v3235_v33  ;;  %v1163_v0 = vmul.f32 0.5, %v1099_v31  ;;  %v3482_v8 = vpop.eup %2477  ;;  %v1100_v43 = vadd.f32 1.0, %v3416_v30 }
 0x160   :  { %v920_v25 = vadd.f32 %v856_v24, %v3452_v9  ;;  %v795_v20 = vmul.f32 %v731_v18, %v3470_v45  ;;  %v730_v56 = vmul.f32 %v3478_v4, %v3478_v4  ;;  %v3493_v33 = vadd.f32 %v3316_v39, %v3368_v11 }
 0x161   :  { %v985_v57 = vmul.f32 0.7978846, %v921_v55  ;;  %2337 = vmatprep.mubr.msk.f32.mxu1 %vm1261_vm2, %v1226_v16  ;;  %v1227_v15 = vmul.f32 %v1163_v0, %v3223_v5  ;;  %v1101_v32 = vadd.f32 1.0, %v3402_v46  ;;  %v1164_v36 = vmul.f32 0.5, %v1100_v43 }
 0x162   :  { %v984_v51 = vmul.f32 0.7978846, %v920_v25  ;;  %v859_v37 = vmul.f32 0.044715, %v795_v20  ;;  %v794_v47 = vmul.f32 %v730_v56, %v3478_v4  ;;  %v2480_v27 = vpop.eup %2479  ;;  %2487 = vtanh.f32 %v982_v3 }
 0x163   :  { %2338 = vmatmul.mubr.msk.f32.gmra.mrb[40].mxu1 %vm1261_vm2, %v1227_v15  ;;  %v733_v30 = vmul.f32 %v3493_v33, %v3493_v33  ;;  %v1165_v59 = vmul.f32 0.5, %v1101_v32  ;;  %v3502_v5 = vadd.f32 %v3316_v39, %v3377_v19  ;;  %2489 = vtanh.f32 %v985_v57 }
 0x164   :  { %v923_v11 = vadd.f32 %v859_v37, %v3470_v45  ;;  %v858_v46 = vmul.f32 0.044715, %v794_v47  ;;  %v1228_v6 = vmul.f32 %v1164_v36, %v3265_v38  ;;  %v3506_v22 = vpop.eup %2481  ;;  %v1102_v2 = vadd.f32 1.0, %v3446_v58 }
 0x165   :  { %v797_v34 = vmul.f32 %v733_v30, %v3493_v33  ;;  %v1229_v53 = vmul.f32 %v1165_v59, %v3254_v26  ;;  %v732_v52 = vmul.f32 %v3502_v5, %v3502_v5  ;;  %2491 = vtanh.f32 %v984_v51 }
 0x166   :  { %v922_v19 = vadd.f32 %v858_v46, %v3478_v4  ;;  %2340 = vmatprep.mubr.msk.f32.mxu1 %vm1261_vm2, %v1228_v6  ;;  %v3517_v50 = vadd.f32 %v3316_v39, %v3396_v63  ;;  %v1103_v38 = vadd.f32 1.0, %v3430_v62  ;;  %v2484_v41 = vpop.eup %2483  ;;  %v1166_v23 = vmul.f32 0.5, %v1102_v2 }
 0x167   :  { %v861_v28 = vmul.f32 0.044715, %v797_v34  ;;  %2341 = vmatmul.mubr.msk.f32.gmra.mrb[42].mxu1 %vm1261_vm2, %v1229_v53  ;;  %v796_v26 = vmul.f32 %v732_v52, %v3502_v5  ;;  %v3524_v58 = vadd.f32 %v3316_v39, %v3400_v1  ;;  %v987_v7 = vmul.f32 0.7978846, %v923_v11 }
 0x168   :  { %v986_v48 = vmul.f32 0.7978846, %v922_v19  ;;  %v735_v31 = vmul.f32 %v3517_v50, %v3517_v50  ;;  %v1167_v63 = vmul.f32 0.5, %v1103_v38  ;;  %v2486_v3 = vpop.eup %2485  ;;  %v1230_v18 = vmul.f32 %v1166_v23, %v3293_v35 }
 0x169   :  { %v925_v62 = vadd.f32 %v861_v28, %v3493_v33  ;;  %v860_v24 = vmul.f32 0.044715, %v796_v26  ;;  %v734_v55 = vmul.f32 %v3524_v58, %v3524_v58  ;;  %v1104_v0 = vadd.f32 1.0, %v2476_v12 }
 0x16a   :  { %2493 = vtanh.f32 %v986_v48  ;;  %v799_v16 = vmul.f32 %v735_v31, %v3517_v50  ;;  %v1231_v1 = vmul.f32 %v1167_v63, %v3284_v54  ;;  %2343 = vmatprep.mubr.msk.f32.mxu1 %vm1261_vm2, %v1230_v18  ;;  %v3539_v43 = vadd.f32 %v3316_v39, %v3424_v21 }
 0x16b   :  { %v989_v25 = vmul.f32 0.7978846, %v925_v62  ;;  %v924_v20 = vadd.f32 %v860_v24, %v3502_v5  ;;  %v798_v56 = vmul.f32 %v734_v55, %v3524_v58  ;;  %v1168_v57 = vmul.f32 0.5, %v1104_v0 }
 0x16c   :  { %v863_v35 = vmul.f32 0.044715, %v799_v16  ;;  %2344 = vmatmul.mubr.msk.f32.gmra.mrb[44].mxu1 %vm1261_vm2, %v1231_v1  ;;  %v1105_v15 = vadd.f32 1.0, %v3456_v17  ;;  %v3545_v54 = vadd.f32 %v3316_v39, %v3428_v10  ;;  %v2488_v12 = vpop.eup %2487  ;;  %2495 = vtanh.f32 %v987_v7 }
 0x16d   :  { %v988_v32 = vmul.f32 0.7978846, %v924_v20  ;;  %v862_v51 = vmul.f32 0.044715, %v798_v56  ;;  %v737_v37 = vmul.f32 %v3539_v43, %v3539_v43  ;;  %v2490_v47 = vpop.eup %2489  ;;  %v1232_v36 = vmul.f32 %v1168_v57, %v3330_v61 }
 0x16e   :  { %v927_v21 = vadd.f32 %v863_v35, %v3517_v50  ;;  %v1169_v30 = vmul.f32 0.5, %v1105_v15  ;;  %v736_v17 = vmul.f32 %v3545_v54, %v3545_v54  ;;  %v1106_v59 = vadd.f32 1.0, %v2480_v27 }
 0x16f   :  { %2497 = vtanh.f32 %v988_v32  ;;  %v926_v39 = vadd.f32 %v862_v51, %v3524_v58  ;;  %v801_v10 = vmul.f32 %v737_v37, %v3539_v43  ;;  %v2492_v11 = vpop.eup %2491  ;;  %2346 = vmatprep.mubr.msk.f32.mxu1 %vm1261_vm2, %v1232_v36  ;;  %v1107_v61 = vadd.f32 1.0, %v3482_v8 }
 0x170   :  { %2499 = vtanh.f32 %v989_v25  ;;  %v1233_v46 = vmul.f32 %v1169_v30, %v3320_v40  ;;  %v800_v6 = vmul.f32 %v736_v17, %v3545_v54  ;;  %v1170_v52 = vmul.f32 0.5, %v1106_v59 }
 0x171   :  { %v990_v34 = vmul.f32 0.7978846, %v926_v39  ;;  %v865_v53 = vmul.f32 0.044715, %v801_v10  ;;  %v1108_v2 = vadd.f32 1.0, %v2484_v41  ;;  %v1171_v28 = vmul.f32 0.5, %v1107_v61 }
 0x172   :  { %v991_v19 = vmul.f32 0.7978846, %v927_v21  ;;  %2347 = vmatmul.mubr.msk.f32.gmra.mrb[46].mxu1 %vm1261_vm2, %v1233_v46  ;;  %v864_v38 = vmul.f32 0.044715, %v800_v6  ;;  %v1109_v27 = vadd.f32 1.0, %v3506_v22  ;;  %v1234_v40 = vmul.f32 %v1170_v52, %v3364_v42 }
 0x173   :  { %2501 = vtanh.f32 %v990_v34  ;;  %v929_v26 = vadd.f32 %v865_v53, %v3539_v43  ;;  %v1172_v23 = vmul.f32 0.5, %v1108_v2  ;;  %v1235_v48 = vmul.f32 %v1171_v28, %v3352_v13 }
 0x174   :  { %v2494_v7 = vpop.eup %2493  ;;  %v928_v8 = vadd.f32 %v864_v38, %v3545_v54  ;;  %v1173_v31 = vmul.f32 0.5, %v1109_v27  ;;  %v1110_v41 = vadd.f32 1.0, %v2488_v12  ;;  %2349 = vmatprep.mubr.msk.f32.mxu1 %vm1261_vm2, %v1234_v40  ;;  %v1111_v62 = vadd.f32 1.0, %v2486_v3 }
 0x175   :  { %v1236_v63 = vmul.f32 %v1172_v23, %v3394_v49  ;;  %v1112_v24 = vadd.f32 1.0, %v2492_v11  ;;  %2503 = vtanh.f32 %v991_v19  ;;  %v993_v55 = vmul.f32 0.7978846, %v929_v26 }
 0x176   :  { %v992_v22 = vmul.f32 0.7978846, %v928_v8  ;;  %2350 = vmatmul.mubr.msk.f32.gmra.mrb[48].mxu1 %vm1261_vm2, %v1235_v48  ;;  %v1174_v18 = vmul.f32 0.5, %v1110_v41  ;;  %v2496_v42 = vpop.eup %2495  ;;  %v1237_v16 = vmul.f32 %v1173_v31, %v3383_v44  ;;  %v1114_v1 = vadd.f32 1.0, %v2494_v7 }
 0x177   :  { %2352 = vmatprep.mubr.msk.f32.mxu1 %vm1261_vm2, %v1236_v63  ;;  %v1176_v13 = vmul.f32 0.5, %v1112_v24  ;;  %v1175_v25 = vmul.f32 0.5, %v1111_v62  ;;  %v1113_v49 = vadd.f32 1.0, %v2490_v47  ;;  %v1115_v12 = vadd.f32 1.0, %v2496_v42 }
 0x178   :  { %2505 = vtanh.f32 %v992_v22  ;;  %v1238_v0 = vmul.f32 %v1174_v18, %v3422_v60  ;;  %v1178_v35 = vmul.f32 0.5, %v1114_v1 }
 0x179   :  { %v2498_v3 = vpop.eup %2497  ;;  %2507 = vtanh.f32 %v993_v55  ;;  %v1240_v56 = vmul.f32 %v1176_v13, %v3452_v9  ;;  %v1239_v44 = vmul.f32 %v1175_v25, %v3413_v14  ;;  %v1177_v15 = vmul.f32 0.5, %v1113_v49 }
 0x17a   :  { %v2500_v20 = vpop.eup %2499  ;;  %2353 = vmatmul.mubr.msk.f32.gmra.mrb[50].mxu1 %vm1261_vm2, %v1237_v16  ;;  %v1116_v57 = vadd.f32 1.0, %v2498_v3  ;;  %v1242_v60 = vmul.f32 %v1178_v35, %v3478_v4  ;;  %v1179_v36 = vmul.f32 0.5, %v1115_v12 }
 0x17b   :  { %2355 = vmatprep.mubr.msk.f32.mxu1 %vm1261_vm2, %v1238_v0  ;;  %v1241_v21 = vmul.f32 %v1177_v15, %v3444_v29  ;;  %v1117_v9 = vadd.f32 1.0, %v2500_v20 }
 0x17c   :  { %v1180_v51 = vmul.f32 0.5, %v1116_v57  ;;  %v1243_v10 = vmul.f32 %v1179_v36, %v3470_v45 }
 0x17d   :  { %v2502_v32 = vpop.eup %2501  ;;  %v1181_v59 = vmul.f32 0.5, %v1117_v9 }
 0x17e   :  { %2356 = vmatmul.mubr.msk.f32.gmra.mrb[52].mxu1 %vm1261_vm2, %v1239_v44  ;;  %v1118_v37 = vadd.f32 1.0, %v2502_v32  ;;  %v1244_v14 = vmul.f32 %v1180_v51, %v3502_v5 }
 0x17f   :  { %2358 = vmatprep.mubr.msk.f32.mxu1 %vm1261_vm2, %v1240_v56  ;;  %v2504_v47 = vpop.eup %2503  ;;  %v1245_v6 = vmul.f32 %v1181_v59, %v3493_v33  ;;  %v3598_v33 = vld [vmem:[%s3924_s4] ss:$0 sm:$0xff] }
 0x180   :  { %v1182_v17 = vmul.f32 0.5, %v1118_v37  ;;  %v1119_v4 = vadd.f32 1.0, %v2504_v47 }
 0x182   :  { %v2506_v30 = vpop.eup %2505  ;;  %2359 = vmatmul.mubr.msk.f32.gmra.mrb[54].mxu1 %vm1261_vm2, %v1241_v21  ;;  %v1246_v29 = vmul.f32 %v1182_v17, %v3524_v58  ;;  %v1183_v61 = vmul.f32 0.5, %v1119_v4 }
 0x183   :  { %2361 = vmatprep.mubr.msk.f32.mxu1 %vm1261_vm2, %v1242_v60  ;;  %v1120_v39 = vadd.f32 1.0, %v2506_v30  ;;  %v2508_v11 = vpop.eup %2507 }
 0x184   :  { %v1121_v34 = vadd.f32 1.0, %v2508_v11  ;;  %v1247_v5 = vmul.f32 %v1183_v61, %v3517_v50 }
 0x185   :  { %v1184_v46 = vmul.f32 0.5, %v1120_v39 }
 0x186   :  { %2362 = vmatmul.mubr.msk.f32.gmra.mrb[56].mxu1 %vm1261_vm2, %v1243_v10  ;;  %v1185_v53 = vmul.f32 0.5, %v1121_v34 }
 0x187   :  { %2364 = vmatprep.mubr.msk.f32.mxu1 %vm1261_vm2, %v1244_v14  ;;  %v1248_v45 = vmul.f32 %v1184_v46, %v3545_v54 }
 0x188   :  { %v1249_v58 = vmul.f32 %v1185_v53, %v3539_v43 }
 0x18a   :  { %2365 = vmatmul.mubr.msk.f32.gmra.mrb[58].mxu1 %vm1261_vm2, %v1245_v6 }
 0x18b   :  { %2367 = vmatprep.mubr.msk.f32.mxu1 %vm1261_vm2, %v1246_v29 }
 0x18e   :  { %2368 = vmatmul.mubr.msk.f32.gmra.mrb[60].mxu1 %vm1261_vm2, %v1247_v5 }
 0x18f   :  { %2370 = vmatprep.mubr.msk.f32.mxu1 %vm1261_vm2, %v1248_v45 }
 0x192   :  { %2371 = vmatmul.mubr.msk.f32.gmra.mrb[62].mxu1 %vm1261_vm2, %v1249_v58 }
 0x1cd   :  { %v2279_v52 = vpop.f32.mrb[0].mxu1 }
 0x1ce   :  { %v1526_v2 = vadd.f32 %v2279_v52, %v3598_v33  ;;  %v1520_v54 = vpop.f32.mrb[1].mxu1 }
 0x1cf   :  { %v1521_v50 = vadd.f32 %v3598_v33, %v1520_v54 }
 0x1d0   :  { %1840 = vst.msk [vmem:[%s3925_s5 + $0x8] sm:$0xff] %vm1261_vm2, %v1526_v2 }
 0x1d1   :  { %1839 = vst.msk [vmem:[%s3925_s5] sm:$0xff] %vm1261_vm2, %v1521_v50 }
 0x1d5   :  { %v2282_v43 = vpop.f32.mrb[2].mxu1 }
 0x1d6   :  { %v1536_v19 = vadd.f32 %v2282_v43, %v3598_v33  ;;  %v1530_v38 = vpop.f32.mrb[3].mxu1 }
 0x1d7   :  { %v1531_v28 = vadd.f32 %v3598_v33, %v1530_v38 }
 0x1d8   :  { %1842 = vst.msk [vmem:[%s3925_s5 + $0x18] sm:$0xff] %vm1261_vm2, %v1536_v19 }
 0x1d9   :  { %1841 = vst.msk [vmem:[%s3925_s5 + $0x10] sm:$0xff] %vm1261_vm2, %v1531_v28 }
 0x1db   :  { %v2285_v27 = vpop.f32.mrb[4].mxu1 }
 0x1dc   :  { %v1546_v26 = vadd.f32 %v2285_v27, %v3598_v33  ;;  %v1540_v40 = vpop.f32.mrb[5].mxu1 }
 0x1dd   :  { %v1541_v23 = vadd.f32 %v3598_v33, %v1540_v40 }
 0x1de   :  { %1844 = vst.msk [vmem:[%s3925_s5 + $0x28] sm:$0xff] %vm1261_vm2, %v1546_v26 }
 0x1df   :  { %1843 = vst.msk [vmem:[%s3925_s5 + $0x20] sm:$0xff] %vm1261_vm2, %v1541_v23 }
 0x1e0   :  { %v2288_v7 = vpop.f32.mrb[6].mxu1 }
 0x1e1   :  { %v1556_v8 = vadd.f32 %v2288_v7, %v3598_v33  ;;  %v1550_v48 = vpop.f32.mrb[7].mxu1 }
 0x1e2   :  { %v1551_v31 = vadd.f32 %v3598_v33, %v1550_v48 }
 0x1e3   :  { %1846 = vst.msk [vmem:[%s3925_s5 + $0x38] sm:$0xff] %vm1261_vm2, %v1556_v8 }
 0x1e4   :  { %1845 = vst.msk [vmem:[%s3925_s5 + $0x30] sm:$0xff] %vm1261_vm2, %v1551_v31 }
 0x1e6   :  { %v2291_v41 = vpop.f32.mrb[8].mxu1 }
 0x1e7   :  { %v1566_v63 = vadd.f32 %v2291_v41, %v3598_v33  ;;  %v1560_v62 = vpop.f32.mrb[9].mxu1 }
 0x1e8   :  { %v1561_v24 = vadd.f32 %v3598_v33, %v1560_v62 }
 0x1e9   :  { %1848 = vst.msk [vmem:[%s3925_s5 + $0x48] sm:$0xff] %vm1261_vm2, %v1566_v63 }
 0x1ea   :  { %1847 = vst.msk [vmem:[%s3925_s5 + $0x40] sm:$0xff] %vm1261_vm2, %v1561_v24  ;;  %v2294_v22 = vpop.f32.mrb[10].mxu1 }
 0x1eb   :  { %v1576_v18 = vadd.f32 %v2294_v22, %v3598_v33  ;;  %v1570_v42 = vpop.f32.mrb[11].mxu1 }
 0x1ec   :  { %v1571_v55 = vadd.f32 %v3598_v33, %v1570_v42 }
 0x1ed   :  { %1850 = vst.msk [vmem:[%s3925_s5 + $0x58] sm:$0xff] %vm1261_vm2, %v1576_v18 }
 0x1ee   :  { %1849 = vst.msk [vmem:[%s3925_s5 + $0x50] sm:$0xff] %vm1261_vm2, %v1571_v55 }
 0x1ef   :  { %v2297_v16 = vpop.f32.mrb[12].mxu1 }
 0x1f0   :  { %v1586_v13 = vadd.f32 %v2297_v16, %v3598_v33  ;;  %v1580_v1 = vpop.f32.mrb[13].mxu1 }
 0x1f1   :  { %v1581_v0 = vadd.f32 %v3598_v33, %v1580_v1 }
 0x1f2   :  { %1852 = vst.msk [vmem:[%s3925_s5 + $0x68] sm:$0xff] %vm1261_vm2, %v1586_v13 }
 0x1f3   :  { %1851 = vst.msk [vmem:[%s3925_s5 + $0x60] sm:$0xff] %vm1261_vm2, %v1581_v0 }
 0x1f4   :  { %v2300_v25 = vpop.f32.mrb[14].mxu1 }
 0x1f5   :  { %v1596_v49 = vadd.f32 %v2300_v25, %v3598_v33  ;;  %v1590_v3 = vpop.f32.mrb[15].mxu1 }
 0x1f6   :  { %v1591_v20 = vadd.f32 %v3598_v33, %v1590_v3 }
 0x1f7   :  { %1854 = vst.msk [vmem:[%s3925_s5 + $0x78] sm:$0xff] %vm1261_vm2, %v1596_v49 }
 0x1f8   :  { %1853 = vst.msk [vmem:[%s3925_s5 + $0x70] sm:$0xff] %vm1261_vm2, %v1591_v20 }
 0x1fa   :  { %v2303_v56 = vpop.f32.mrb[16].mxu1 }
 0x1fb   :  { %v1606_v35 = vadd.f32 %v2303_v56, %v3598_v33  ;;  %v1600_v57 = vpop.f32.mrb[17].mxu1 }
 0x1fc   :  { %v1601_v44 = vadd.f32 %v3598_v33, %v1600_v57 }
 0x1fd   :  { %1856 = vst.msk [vmem:[%s3925_s5 + $0x88] sm:$0xff] %vm1261_vm2, %v1606_v35 }
 0x1fe   :  { %1855 = vst.msk [vmem:[%s3925_s5 + $0x80] sm:$0xff] %vm1261_vm2, %v1601_v44  ;;  %v2306_v15 = vpop.f32.mrb[18].mxu1 }
 0x1ff   :  { %v1616_v12 = vadd.f32 %v2306_v15, %v3598_v33  ;;  %v1610_v32 = vpop.f32.mrb[19].mxu1 }
 0x200   :  { %v1611_v60 = vadd.f32 %v3598_v33, %v1610_v32 }
 0x201   :  { %1858 = vst.msk [vmem:[%s3925_s5 + $0x98] sm:$0xff] %vm1261_vm2, %v1616_v12 }
 0x202   :  { %1857 = vst.msk [vmem:[%s3925_s5 + $0x90] sm:$0xff] %vm1261_vm2, %v1611_v60 }
 0x203   :  { %v2309_v51 = vpop.f32.mrb[20].mxu1 }
 0x204   :  { %v1626_v37 = vadd.f32 %v2309_v51, %v3598_v33  ;;  %v1620_v47 = vpop.f32.mrb[21].mxu1 }
 0x205   :  { %v1621_v21 = vadd.f32 %v3598_v33, %v1620_v47 }
 0x206   :  { %1860 = vst.msk [vmem:[%s3925_s5 + $0xa8] sm:$0xff] %vm1261_vm2, %v1626_v37 }
 0x207   :  { %1859 = vst.msk [vmem:[%s3925_s5 + $0xa0] sm:$0xff] %vm1261_vm2, %v1621_v21 }
 0x208   :  { %v2312_v36 = vpop.f32.mrb[22].mxu1 }
 0x209   :  { %v1636_v9 = vadd.f32 %v2312_v36, %v3598_v33  ;;  %v1630_v30 = vpop.f32.mrb[23].mxu1 }
 0x20a   :  { %v1631_v14 = vadd.f32 %v3598_v33, %v1630_v30 }
 0x20b   :  { %1862 = vst.msk [vmem:[%s3925_s5 + $0xb8] sm:$0xff] %vm1261_vm2, %v1636_v9 }
 0x20c   :  { %1861 = vst.msk [vmem:[%s3925_s5 + $0xb0] sm:$0xff] %vm1261_vm2, %v1631_v14 }
 0x20e   :  { %v2315_v17 = vpop.f32.mrb[24].mxu1 }
 0x20f   :  { %v1646_v39 = vadd.f32 %v2315_v17, %v3598_v33  ;;  %v1640_v10 = vpop.f32.mrb[25].mxu1 }
 0x210   :  { %v1641_v59 = vadd.f32 %v3598_v33, %v1640_v10 }
 0x211   :  { %1864 = vst.msk [vmem:[%s3925_s5 + $0xc8] sm:$0xff] %vm1261_vm2, %v1646_v39 }
 0x212   :  { %1863 = vst.msk [vmem:[%s3925_s5 + $0xc0] sm:$0xff] %vm1261_vm2, %v1641_v59  ;;  %v2318_v4 = vpop.f32.mrb[26].mxu1 }
 0x213   :  { %v1656_v11 = vadd.f32 %v2318_v4, %v3598_v33  ;;  %v1650_v29 = vpop.f32.mrb[27].mxu1 }
 0x214   :  { %v1651_v46 = vadd.f32 %v3598_v33, %v1650_v29 }
 0x215   :  { %1866 = vst.msk [vmem:[%s3925_s5 + $0xd8] sm:$0xff] %vm1261_vm2, %v1656_v11 }
 0x216   :  { %1865 = vst.msk [vmem:[%s3925_s5 + $0xd0] sm:$0xff] %vm1261_vm2, %v1651_v46 }
 0x217   :  { %v2321_v6 = vpop.f32.mrb[28].mxu1 }
 0x218   :  { %v1666_v61 = vadd.f32 %v2321_v6, %v3598_v33  ;;  %v1660_v34 = vpop.f32.mrb[29].mxu1 }
 0x219   :  { %v1661_v45 = vadd.f32 %v3598_v33, %v1660_v34 }
 0x21a   :  { %1868 = vst.msk [vmem:[%s3925_s5 + $0xe8] sm:$0xff] %vm1261_vm2, %v1666_v61 }
 0x21b   :  { %1867 = vst.msk [vmem:[%s3925_s5 + $0xe0] sm:$0xff] %vm1261_vm2, %v1661_v45 }
 0x21c   :  { %v2324_v5 = vpop.f32.mrb[30].mxu1 }
 0x21d   :  { %v1676_v53 = vadd.f32 %v2324_v5, %v3598_v33  ;;  %v1670_v58 = vpop.f32.mrb[31].mxu1 }
 0x21e   :  { %v1671_v52 = vadd.f32 %v3598_v33, %v1670_v58 }
 0x21f   :  { %1870 = vst.msk [vmem:[%s3925_s5 + $0xf8] sm:$0xff] %vm1261_vm2, %v1676_v53 }
 0x220   :  { %1869 = vst.msk [vmem:[%s3925_s5 + $0xf0] sm:$0xff] %vm1261_vm2, %v1671_v52 }
 0x222   :  { %v2327_v2 = vpop.f32.mrb[32].mxu1 }
 0x223   :  { %v1686_v54 = vadd.f32 %v2327_v2, %v3598_v33  ;;  %v1680_v50 = vpop.f32.mrb[33].mxu1 }
 0x224   :  { %v1681_v43 = vadd.f32 %v3598_v33, %v1680_v50 }
 0x225   :  { %1872 = vst.msk [vmem:[%s3925_s5 + $0x108] sm:$0xff] %vm1261_vm2, %v1686_v54 }
 0x226   :  { %1871 = vst.msk [vmem:[%s3925_s5 + $0x100] sm:$0xff] %vm1261_vm2, %v1681_v43  ;;  %v2330_v19 = vpop.f32.mrb[34].mxu1 }
 0x227   :  { %v1696_v38 = vadd.f32 %v2330_v19, %v3598_v33  ;;  %v1690_v28 = vpop.f32.mrb[35].mxu1 }
 0x228   :  { %v1691_v27 = vadd.f32 %v3598_v33, %v1690_v28 }
 0x229   :  { %1874 = vst.msk [vmem:[%s3925_s5 + $0x118] sm:$0xff] %vm1261_vm2, %v1696_v38 }
 0x22a   :  { %1873 = vst.msk [vmem:[%s3925_s5 + $0x110] sm:$0xff] %vm1261_vm2, %v1691_v27 }
 0x22b   :  { %v2333_v26 = vpop.f32.mrb[36].mxu1 }
 0x22c   :  { %v1706_v40 = vadd.f32 %v2333_v26, %v3598_v33  ;;  %v1700_v23 = vpop.f32.mrb[37].mxu1 }
 0x22d   :  { %v1701_v7 = vadd.f32 %v3598_v33, %v1700_v23 }
 0x22e   :  { %1876 = vst.msk [vmem:[%s3925_s5 + $0x128] sm:$0xff] %vm1261_vm2, %v1706_v40 }
 0x22f   :  { %1875 = vst.msk [vmem:[%s3925_s5 + $0x120] sm:$0xff] %vm1261_vm2, %v1701_v7 }
 0x230   :  { %v2336_v8 = vpop.f32.mrb[38].mxu1 }
 0x231   :  { %v1716_v48 = vadd.f32 %v2336_v8, %v3598_v33  ;;  %v1710_v31 = vpop.f32.mrb[39].mxu1 }
 0x232   :  { %v1711_v41 = vadd.f32 %v3598_v33, %v1710_v31 }
 0x233   :  { %1878 = vst.msk [vmem:[%s3925_s5 + $0x138] sm:$0xff] %vm1261_vm2, %v1716_v48 }
 0x234   :  { %1877 = vst.msk [vmem:[%s3925_s5 + $0x130] sm:$0xff] %vm1261_vm2, %v1711_v41 }
 0x236   :  { %v2339_v63 = vpop.f32.mrb[40].mxu1 }
 0x237   :  { %v1726_v62 = vadd.f32 %v2339_v63, %v3598_v33  ;;  %v1720_v24 = vpop.f32.mrb[41].mxu1 }
 0x238   :  { %v1721_v22 = vadd.f32 %v3598_v33, %v1720_v24 }
 0x239   :  { %1880 = vst.msk [vmem:[%s3925_s5 + $0x148] sm:$0xff] %vm1261_vm2, %v1726_v62 }
 0x23a   :  { %1879 = vst.msk [vmem:[%s3925_s5 + $0x140] sm:$0xff] %vm1261_vm2, %v1721_v22  ;;  %v2342_v18 = vpop.f32.mrb[42].mxu1 }
 0x23b   :  { %v1736_v42 = vadd.f32 %v2342_v18, %v3598_v33  ;;  %v1730_v55 = vpop.f32.mrb[43].mxu1 }
 0x23c   :  { %v1731_v16 = vadd.f32 %v3598_v33, %v1730_v55 }
 0x23d   :  { %1882 = vst.msk [vmem:[%s3925_s5 + $0x158] sm:$0xff] %vm1261_vm2, %v1736_v42 }
 0x23e   :  { %1881 = vst.msk [vmem:[%s3925_s5 + $0x150] sm:$0xff] %vm1261_vm2, %v1731_v16 }
 0x23f   :  { %v2345_v13 = vpop.f32.mrb[44].mxu1 }
 0x240   :  { %v1746_v1 = vadd.f32 %v2345_v13, %v3598_v33  ;;  %v1740_v0 = vpop.f32.mrb[45].mxu1 }
 0x241   :  { %v1741_v25 = vadd.f32 %v3598_v33, %v1740_v0 }
 0x242   :  { %1884 = vst.msk [vmem:[%s3925_s5 + $0x168] sm:$0xff] %vm1261_vm2, %v1746_v1 }
 0x243   :  { %1883 = vst.msk [vmem:[%s3925_s5 + $0x160] sm:$0xff] %vm1261_vm2, %v1741_v25 }
 0x245   :  { %v2348_v49 = vpop.f32.mrb[46].mxu1 }
 0x246   :  { %v1756_v3 = vadd.f32 %v2348_v49, %v3598_v33  ;;  %v1750_v20 = vpop.f32.mrb[47].mxu1 }
 0x247   :  { %v1751_v56 = vadd.f32 %v3598_v33, %v1750_v20 }
 0x248   :  { %1886 = vst.msk [vmem:[%s3925_s5 + $0x178] sm:$0xff] %vm1261_vm2, %v1756_v3 }
 0x249   :  { %1885 = vst.msk [vmem:[%s3925_s5 + $0x170] sm:$0xff] %vm1261_vm2, %v1751_v56  ;;  %v2351_v35 = vpop.f32.mrb[48].mxu1 }
 0x24a   :  { %v1766_v57 = vadd.f32 %v2351_v35, %v3598_v33  ;;  %v1760_v44 = vpop.f32.mrb[49].mxu1 }
 0x24b   :  { %v1761_v15 = vadd.f32 %v3598_v33, %v1760_v44 }
 0x24c   :  { %1888 = vst.msk [vmem:[%s3925_s5 + $0x188] sm:$0xff] %vm1261_vm2, %v1766_v57 }
 0x24d   :  { %1887 = vst.msk [vmem:[%s3925_s5 + $0x180] sm:$0xff] %vm1261_vm2, %v1761_v15  ;;  %v2354_v12 = vpop.f32.mrb[50].mxu1 }
 0x24e   :  { %v1776_v32 = vadd.f32 %v2354_v12, %v3598_v33  ;;  %v1770_v60 = vpop.f32.mrb[51].mxu1 }
 0x24f   :  { %v1771_v51 = vadd.f32 %v3598_v33, %v1770_v60 }
 0x250   :  { %1890 = vst.msk [vmem:[%s3925_s5 + $0x198] sm:$0xff] %vm1261_vm2, %v1776_v32 }
 0x251   :  { %1889 = vst.msk [vmem:[%s3925_s5 + $0x190] sm:$0xff] %vm1261_vm2, %v1771_v51  ;;  %v2357_v37 = vpop.f32.mrb[52].mxu1 }
 0x252   :  { %v1786_v47 = vadd.f32 %v2357_v37, %v3598_v33  ;;  %v1780_v21 = vpop.f32.mrb[53].mxu1 }
 0x253   :  { %v1781_v36 = vadd.f32 %v3598_v33, %v1780_v21 }
 0x254   :  { %1892 = vst.msk [vmem:[%s3925_s5 + $0x1a8] sm:$0xff] %vm1261_vm2, %v1786_v47 }
 0x255   :  { %1891 = vst.msk [vmem:[%s3925_s5 + $0x1a0] sm:$0xff] %vm1261_vm2, %v1781_v36  ;;  %v2360_v9 = vpop.f32.mrb[54].mxu1 }
 0x256   :  { %v1796_v30 = vadd.f32 %v2360_v9, %v3598_v33  ;;  %v1790_v14 = vpop.f32.mrb[55].mxu1 }
 0x257   :  { %v1791_v17 = vadd.f32 %v3598_v33, %v1790_v14 }
 0x258   :  { %1894 = vst.msk [vmem:[%s3925_s5 + $0x1b8] sm:$0xff] %vm1261_vm2, %v1796_v30 }
 0x259   :  { %1893 = vst.msk [vmem:[%s3925_s5 + $0x1b0] sm:$0xff] %vm1261_vm2, %v1791_v17  ;;  %v2363_v39 = vpop.f32.mrb[56].mxu1 }
 0x25a   :  { %v1806_v10 = vadd.f32 %v2363_v39, %v3598_v33  ;;  %v1800_v59 = vpop.f32.mrb[57].mxu1 }
 0x25b   :  { %v1801_v4 = vadd.f32 %v3598_v33, %v1800_v59 }
 0x25c   :  { %1896 = vst.msk [vmem:[%s3925_s5 + $0x1c8] sm:$0xff] %vm1261_vm2, %v1806_v10 }
 0x25d   :  { %1895 = vst.msk [vmem:[%s3925_s5 + $0x1c0] sm:$0xff] %vm1261_vm2, %v1801_v4  ;;  %v2366_v11 = vpop.f32.mrb[58].mxu1 }
 0x25e   :  { %v1816_v29 = vadd.f32 %v2366_v11, %v3598_v33  ;;  %v1810_v46 = vpop.f32.mrb[59].mxu1 }
 0x25f   :  { %v1811_v6 = vadd.f32 %v3598_v33, %v1810_v46 }
 0x260   :  { %1898 = vst.msk [vmem:[%s3925_s5 + $0x1d8] sm:$0xff] %vm1261_vm2, %v1816_v29 }
 0x261   :  { %1897 = vst.msk [vmem:[%s3925_s5 + $0x1d0] sm:$0xff] %vm1261_vm2, %v1811_v6  ;;  %v2369_v61 = vpop.f32.mrb[60].mxu1 }
 0x262   :  { %v1826_v34 = vadd.f32 %v2369_v61, %v3598_v33  ;;  %v1820_v45 = vpop.f32.mrb[61].mxu1 }
 0x263   :  { %v1821_v5 = vadd.f32 %v3598_v33, %v1820_v45 }
 0x264   :  { %1900 = vst.msk [vmem:[%s3925_s5 + $0x1e8] sm:$0xff] %vm1261_vm2, %v1826_v34 }
 0x265   :  { %1899 = vst.msk [vmem:[%s3925_s5 + $0x1e0] sm:$0xff] %vm1261_vm2, %v1821_v5  ;;  %v2372_v53 = vpop.f32.mrb[62].mxu1 }
 0x266   :  { %v1836_v58 = vadd.f32 %v2372_v53, %v3598_v33  ;;  %v1830_v52 = vpop.f32.mrb[63].mxu1 }
 0x267   :  { %v1831_v2 = vadd.f32 %v3598_v33, %v1830_v52 }
 0x268   :  { %1902 = vst.msk [vmem:[%s3925_s5 + $0x1f8] sm:$0xff] %vm1261_vm2, %v1836_v58 }
 0x269   :  { %1901 = vst.msk [vmem:[%s3925_s5 + $0x1f0] sm:$0xff] %vm1261_vm2, %v1831_v2 }

</bundles_post_ra>
